<compile_context>
chip_gen: v6e
topology: v6e:2x2x1
jax: 0.10.0
libtpu: 0.0.40
codegen_flags: <defaults>
</compile_context>

<pallas_src>
import jax
import jax.numpy as jnp
import numpy as np
from jax.experimental import pallas as pl
from jax.experimental.pallas import tpu as pltpu


def _round_up(n, m):
    return ((n + m - 1) // m) * m


def convkb_kernel(x_ref, w1_ref, b1_ref, w2_ref, b2_ref, out_ref):
    # x_ref  : (TB, L*D)   input dtype (f32 or bf16), batch rows on sublanes
    # w1_ref : (L*D, O*D)  conv-as-matmul weight (same dtype as x), VMEM resident
    # b1_ref : (1, O*D)    f32 conv bias row (broadcast over batch rows)
    # w2_ref : (O*D, 1)    f32 fc weight column, VMEM resident
    # b2_ref : (1,)        f32 fc bias (SMEM scalar)
    # out_ref: (TB, 1)     f32 output column
    # Conv2d(1, O, (1, 3)) as one MXU contraction over L*D (f32 accumulate).
    c = jnp.dot(x_ref[...], w1_ref[...],
                preferred_element_type=jnp.float32,
                precision=jax.lax.Precision.HIGHEST)
    # Conv bias + ReLU on the VPU.
    # TODO(synk): training-mode dropout is not implemented (eval-mode identity).
    h = jnp.maximum(c + b1_ref[...], 0.0)
    # Linear(O*D, 1): second MXU contraction, then scalar bias.
    y = jnp.dot(h, w2_ref[...],
                preferred_element_type=jnp.float32,
                precision=jax.lax.Precision.HIGHEST)
    out_ref[...] = (y + b2_ref[0]).astype(out_ref.dtype)


def convkb_forward(x, conv_w, conv_b, fc_w, fc_b, *, tile_b=2048):
    """x: (B, L, D); conv_w: (O, 1, 1, L); conv_b: (O,); fc_w: (1, O*D); fc_b: (1,).
    Returns (B, 1) float32. Pass bf16 `x` to halve HBM traffic (v5e/v6e)."""
    B, L, D = x.shape
    O = conv_w.shape[0]
    LD, OD = L * D, O * D

    # Batch tile: big enough to amortize per-step overhead, >= 2 grid steps for
    # large batches (v7x megacore), sublane-aligned (or spanning the full batch).
    want_steps = 2 if B >= 2048 else 1
    cap = min(tile_b, -(-B // want_steps))
    if cap >= B:
        tb, Bp = B, B                       # single block == full (small) batch
    else:
        tb = _round_up(cap, 8)
        Bp = _round_up(B, tb)

    # Free, contiguous reshape -- no HBM transpose. Pad only if tile-unaligned.
    x2 = x.reshape(B, LD)
    if Bp != B:
        x2 = jnp.pad(x2, ((0, Bp - B), (0, 0)))

    # Conv2d(1, O, (1, L)) as a dense (L*D, O*D) matrix:
    #   w1[l*D + p, o*D + d] = conv_w[o, 0, 0, l] * delta(p, d)
    wc = conv_w.reshape(O, L).astype(jnp.float32)
    eye = jnp.eye(D, dtype=jnp.float32)
    w1 = jnp.einsum("ol,pd->lpod", wc, eye).reshape(LD, OD).astype(x.dtype)
    b1 = jnp.repeat(conv_b.astype(jnp.float32), D).reshape(1, OD)   # index o*D+d
    w2 = fc_w.reshape(OD, 1).astype(jnp.float32)    # matches view(B, O*D) order
    b2 = fc_b.reshape(1).astype(jnp.float32)

    out = pl.pallas_call(
        convkb_kernel,
        out_shape=jax.ShapeDtypeStruct((Bp, 1), jnp.float32),
        grid=(Bp // tb,),
        in_specs=[
            pl.BlockSpec((tb, LD), lambda i: (i, 0)),    # streamed batch tile
            pl.BlockSpec((LD, OD), lambda i: (0, 0)),    # resident conv matrix
            pl.BlockSpec((1, OD), lambda i: (0, 0)),     # resident conv bias row
            pl.BlockSpec((OD, 1), lambda i: (0, 0)),     # resident fc column
            pl.BlockSpec(memory_space=pltpu.MemorySpace.SMEM),   # fc bias scalar
        ],
        out_specs=pl.BlockSpec((tb, 1), lambda i: (i, 0)),
        compiler_params=pltpu.CompilerParams(
            dimension_semantics=("parallel",)),
    )(x2, w1, b1, w2, b2)

    return out[:B]


def _xavier_uniform(key, shape, fan_in, fan_out, gain):
    bound = gain * np.sqrt(6.0 / (fan_in + fan_out))
    return jax.random.uniform(key, shape, jnp.float32, -bound, bound)


def _reference(x, conv_w, conv_b, fc_w, fc_b):
    # Host-side float64 reference mirroring the PyTorch forward.
    x = np.asarray(x, np.float64)
    B, L, D = x.shape
    O = conv_w.shape[0]
    wc = np.asarray(conv_w, np.float64).reshape(O, L)
    conv = np.einsum("bwd,ow->bod", x, wc) + np.asarray(conv_b, np.float64)[None, :, None]
    h = np.maximum(conv, 0.0)
    flat = h.reshape(B, O * D)
    return flat @ np.asarray(fc_w, np.float64).T + np.asarray(fc_b, np.float64)[None, :]


if __name__ == "__main__":
    # ConvKB(input_dim=50, in_channels=1, out_channels=4, drop_prob=0.0)
    # The module hardcodes the fc input to 50*out_channels and kernel width 3,
    # so D (embedding dim) must be 50 and L (sequence length) must be 3.
    B, L, D, O = 2, 3, 50, 4

    key = jax.random.PRNGKey(0)
    k_x, k_cw, k_cb, k_fw, k_fb = jax.random.split(key, 5)

    x = jax.random.normal(k_x, (B, L, D), jnp.float32)

    # Conv2d(1, O, (1, 3)) weight (O, 1, 1, 3), xavier_uniform gain=1.414.
    conv_w = _xavier_uniform(k_cw, (O, 1, 1, L),
                             fan_in=1 * 1 * L, fan_out=O * 1 * L, gain=1.414)
    conv_b = jax.random.uniform(k_cb, (O,), jnp.float32,
                                -1.0 / np.sqrt(L), 1.0 / np.sqrt(L))
    # Linear(50*O, 1) weight (1, 50*O), xavier_uniform gain=1.414.
    fc_w = _xavier_uniform(k_fw, (1, D * O), fan_in=D * O, fan_out=1, gain=1.414)
    fc_b = jax.random.uniform(k_fb, (1,), jnp.float32,
                              -1.0 / np.sqrt(D * O), 1.0 / np.sqrt(D * O))

    out = convkb_forward(x, conv_w, conv_b, fc_w, fc_b)
    out = jax.block_until_ready(out)

    ref = _reference(x, conv_w, conv_b, fc_w, fc_b)
    assert out.shape == (B, 1), out.shape
    np.testing.assert_allclose(np.asarray(out), ref, rtol=1e-4, atol=1e-4)

    print("KERNEL_OK")
</pallas_src>

<mosaic_0001>
module attributes {stable_mosaic.version = 11 : i64} {
  func.func @convkb_kernel(%arg0: i32, %arg1: memref<2x150xf32, #tpu.memory_space<vmem>>, %arg2: memref<150x200xf32, #tpu.memory_space<vmem>>, %arg3: memref<1x200xf32, #tpu.memory_space<vmem>>, %arg4: memref<200x1xf32, #tpu.memory_space<vmem>>, %arg5: memref<1xf32, #tpu.memory_space<smem>>, %arg6: memref<2x1xf32, #tpu.memory_space<vmem>>) attributes {dimension_semantics = [#tpu.dimension_semantics<parallel>], iteration_bounds = array<i64: 1>, scalar_prefetch = 0 : i64, scratch_operands = 0 : i64, tpu.core_type = #tpu.core_type<tc>, window_params = [{transform_indices = @transform_0, window_bounds = array<i64: 2, 150>}, {pipeline_mode = #tpu.pipeline_mode<synchronous>, transform_indices = @transform_1, window_bounds = array<i64: 150, 200>}, {pipeline_mode = #tpu.pipeline_mode<synchronous>, transform_indices = @transform_2, window_bounds = array<i64: 1, 200>}, {pipeline_mode = #tpu.pipeline_mode<synchronous>, transform_indices = @transform_3, window_bounds = array<i64: 200, 1>}, {transform_indices = @transform_4, window_bounds = array<i64: 1>}, {transform_indices = @transform_5, window_bounds = array<i64: 2, 1>}]} {
    %c0 = arith.constant 0 : index
    %c0_0 = arith.constant 0 : index
    %0 = vector.load %arg1[%c0, %c0_0] : memref<2x150xf32, #tpu.memory_space<vmem>>, vector<2x150xf32>
    %c0_1 = arith.constant 0 : index
    %c0_2 = arith.constant 0 : index
    %1 = vector.load %arg2[%c0_1, %c0_2] : memref<150x200xf32, #tpu.memory_space<vmem>>, vector<150x200xf32>
    %cst = arith.constant dense<0.000000e+00> : vector<2x200xf32>
    %2 = tpu.matmul %0, %1, %cst {dimension_numbers = #tpu.dot_dimension_numbers<[1], [0], [0], [1], [0, 0, 1, 1], [], []>, precision = #tpu.contract_precision<fp32>} : vector<2x150xf32>, vector<150x200xf32>, vector<2x200xf32> -> vector<2x200xf32>
    %c0_3 = arith.constant 0 : index
    %c0_4 = arith.constant 0 : index
    %3 = vector.load %arg3[%c0_3, %c0_4] : memref<1x200xf32, #tpu.memory_space<vmem>>, vector<1x200xf32>
    %4 = vector.broadcast %3 : vector<1x200xf32> to vector<2x200xf32>
    %5 = arith.addf %2, %4 : vector<2x200xf32>
    %cst_5 = arith.constant 0.000000e+00 : f32
    %6 = vector.broadcast %cst_5 : f32 to vector<2x200xf32>
    %7 = arith.maximumf %5, %6 : vector<2x200xf32>
    %c0_6 = arith.constant 0 : index
    %c0_7 = arith.constant 0 : index
    %8 = vector.load %arg4[%c0_6, %c0_7] : memref<200x1xf32, #tpu.memory_space<vmem>>, vector<200x1xf32>
    %cst_8 = arith.constant dense<0.000000e+00> : vector<2x1xf32>
    %9 = tpu.matmul %7, %8, %cst_8 {dimension_numbers = #tpu.dot_dimension_numbers<[1], [0], [0], [1], [0, 0, 1, 1], [], []>, precision = #tpu.contract_precision<fp32>} : vector<2x200xf32>, vector<200x1xf32>, vector<2x1xf32> -> vector<2x1xf32>
    %c0_9 = arith.constant 0 : index
    %10 = memref.load %arg5[%c0_9] : memref<1xf32, #tpu.memory_space<smem>>
    %11 = vector.broadcast %10 : f32 to vector<2x1xf32>
    %12 = arith.addf %9, %11 : vector<2x1xf32>
    %c0_10 = arith.constant 0 : index
    %c0_11 = arith.constant 0 : index
    %13 = vector.load %arg6[%c0_10, %c0_11] : memref<2x1xf32, #tpu.memory_space<vmem>>, vector<2x1xf32>
    tpu.vector_store %arg6[%c0_10, %c0_11], %12 {strides = array<i32>} : memref<2x1xf32, #tpu.memory_space<vmem>>, vector<2x1xf32>,
    return
  }
  func.func @transform_0(%arg0: i32) -> (i32, i32) {
    %c0_i32 = arith.constant 0 : i32
    %c0_i32_0 = arith.constant 0 : i32
    return %arg0, %c0_i32 : i32, i32
  }
  func.func @transform_1(%arg0: i32) -> (i32, i32) {
    %c0_i32 = arith.constant 0 : i32
    %c0_i32_0 = arith.constant 0 : i32
    %c0_i32_1 = arith.constant 0 : i32
    return %c0_i32, %c0_i32_0 : i32, i32
  }
  func.func @transform_2(%arg0: i32) -> (i32, i32) {
    %c0_i32 = arith.constant 0 : i32
    %c0_i32_0 = arith.constant 0 : i32
    %c0_i32_1 = arith.constant 0 : i32
    return %c0_i32, %c0_i32_0 : i32, i32
  }
  func.func @transform_3(%arg0: i32) -> (i32, i32) {
    %c0_i32 = arith.constant 0 : i32
    %c0_i32_0 = arith.constant 0 : i32
    %c0_i32_1 = arith.constant 0 : i32
    return %c0_i32, %c0_i32_0 : i32, i32
  }
  func.func @transform_4(%arg0: i32) -> i32 {
    %c0_i32 = arith.constant 0 : i32
    %c0_i32_0 = arith.constant 0 : i32
    return %c0_i32 : i32
  }
  func.func @transform_5(%arg0: i32) -> (i32, i32) {
    %c0_i32 = arith.constant 0 : i32
    %c0_i32_0 = arith.constant 0 : i32
    return %arg0, %c0_i32 : i32, i32
  }
}

</mosaic_0001>

<bundles_post_ra>
// kernel: tpu_custom_call.1
= control target key start
LH: loop header
LB: loop body
LE: loop exit
PB: predicated region body
PF: predicated region fallthrough
CT: control target
= control target key end

     0   :  { %11 = vsyncpa [#allocation4], 0  ;;  %s1890_s18 = smov [#allocation3]   ;;  %s3279_s0 = inlined_call_operand.vmem [shape: f32[2,150], index: 0, kind: input, shape index: {}]   ;;  %s3280_s1 = inlined_call_operand.hbm [shape: f32[150,200], index: 1, kind: input, shape index: {}]   ;;  %s3281_s2 = inlined_call_operand.vmem [shape: f32[1,200], index: 2, kind: input, shape index: {}]   ;;  %s3282_s3 = inlined_call_operand.vmem [shape: f32[200,1], index: 3, kind: input, shape index: {}]   ;;  %s3283_s4 = inlined_call_operand.<no memory space> [shape: f32[1], index: 4, kind: input, shape index: {}]   ;;  %s3284_s5 = inlined_call_operand.vmem [shape: f32[2,1], index: 5, kind: output, shape index: {}]  }
   0x1   :  { %s19_s19 = sshll.u32 %s1890_s18, 4  ;;  %s20_s19 = int_to_ptr.vmem [resolvable:$true] %s19_s19 }
   0x2   :  { %s1876_s20 = scalar_lea.vmem %s20_s19, 4864  ;;  %p1881_p1 = scmp.lt.s32.totalorder %s20_s19, %s20_s19 }
   0x3   :  { %p1877_p0 = scmp.ne.s32.totalorder %s20_s19, %s1876_s20  ;;  %p1882_p2 = scmp.lt.s32.totalorder %s1876_s20, %s1876_s20 }
   0x5   :  { %p1883_p3 = por %p1882_p2, %p1881_p1 }
   0x7   :  { %p1884_p4 = pnand %p1883_p3, %p1877_p0 }
   0x9   :  { %1887 = shalt.err (!%p1884_p4)
}
   0xa   :  { %s1891_s21 = smov 256   ;;  %s1892_s22 = smov 16  }
   0xb   :  { %25 = dma.hbm_to_vmem [thread:$0]  %s3280_s1, 4864, %s20_s19, [#allocation4], %s1891_s21, %s1891_s21, %s1892_s22  }
   0xc   :  { %1888 = dma.done.wait [#allocation4], 4864  }
   0xd   :  { %1889 = vsyncadd [#allocation4], 4294962432  ;;  %v67_v0 = vld [vmem:[#allocation3 + $0xf8] sm:$0xff]  ;;  %v66_v1 = vld [vmem:[#allocation3 + $0xf0] sm:$0xff]  ;;  %vm99_vm0 = vcmask 1045504   ;;  %vm96_vm1 = vcmask 179200  }
   0xe   :  { %v65_v2 = vld [vmem:[#allocation3 + $0xe8] sm:$0xff]  ;;  %v1927_v3 = vand.u32 4294901760, %v67_v0  ;;  %v1929_v4 = vand.u32 4294901760, %v66_v1  ;;  %v64_v6 = vld [vmem:[#allocation3 + $0xe0] sm:$0xff]  ;;  %v63_v7 = vld [vmem:[#allocation3 + $0xd8] sm:$0xff]  ;;  %vm1081_vm2 = vcmask 588800  }
   0xf   :  { %v1931_v5 = vand.u32 4294901760, %v65_v2  ;;  %v62_v8 = vld [vmem:[#allocation3 + $0xd0] sm:$0xff]  ;;  %v1933_v9 = vand.u32 4294901760, %v64_v6  ;;  %v1935_v10 = vand.u32 4294901760, %v63_v7  ;;  %v61_v12 = vld [vmem:[#allocation3 + $0xc8] sm:$0xff]  ;;  %v60_v13 = vld [vmem:[#allocation3 + $0xc0] sm:$0xff] }
  0x10   :  { %v1937_v11 = vand.u32 4294901760, %v62_v8  ;;  %v59_v14 = vld [vmem:[#allocation3 + $0xb8] sm:$0xff]  ;;  %107 = vmatprep.subr.mxu0 %v1927_v3  ;;  %v1940_v15 = vand.u32 4294901760, %v61_v12  ;;  %v1942_v16 = vand.u32 4294901760, %v60_v13  ;;  %v1947_v18 = vsub.f32 %v67_v0, %v1927_v3  ;;  %v1949_v19 = vld [vmem:[#allocation3 + $0xb0] sm:$0xff]  ;;  %v1951_v20 = vld [vmem:[#allocation3 + $0xa8] sm:$0xff] }
  0x11   :  { %v1944_v17 = vand.u32 4294901760, %v59_v14  ;;  %v1953_v21 = vld [vmem:[#allocation3 + $0xa0] sm:$0xff]  ;;  %109 = vmatpush1.msra.mxu0 %v1929_v4  ;;  %v1957_v22 = vand.u32 4294901760, %v1949_v19  ;;  %v1960_v23 = vsub.f32 %v66_v1, %v1929_v4  ;;  %v1963_v24 = vand.u32 4294901760, %v1951_v20  ;;  %v1968_v26 = vld [vmem:[#allocation3 + $0x98] sm:$0xff]  ;;  %v1970_v27 = vld [vmem:[#allocation3 + $0x90] sm:$0xff] }
  0x12   :  { %3430 = vst [vmem:[#allocation6_spill] sm:$0xff] %v1947_v18  ;;  %v1966_v25 = vsub.f32 %v65_v2, %v1931_v5  ;;  %v1972_v28 = vld [vmem:[#allocation3 + $0x88] sm:$0xff]  ;;  %111 = vmatprep.subr.mxu0 %v1931_v5  ;;  %v3298_v29 = vand.u32 4294901760, %v1947_v18  ;;  %v1977_v30 = vand.u32 4294901760, %v1953_v21  ;;  %v1980_v31 = vsub.f32 %v64_v6, %v1933_v9  ;;  %v1994_v37 = vld [vmem:[#allocation3 + $0x80] sm:$0xff]  ;;  %v2018_v46 = vld [vmem:[#allocation3 + $0x78] sm:$0xff] }
  0x13   :  { %v1983_v32 = vand.u32 4294901760, %v1968_v26  ;;  %113 = vmatpush1.msra.mxu0 %v1933_v9  ;;  %v3296_v33 = vand.u32 4294901760, %v1960_v23  ;;  %v1989_v35 = vsub.f32 %v63_v7, %v1935_v10  ;;  %v1992_v36 = vand.u32 4294901760, %v1970_v27  ;;  %v2028_v51 = vld [vmem:[#allocation3 + $0x70] sm:$0xff]  ;;  %v2035_v56 = vld [vmem:[#allocation3 + $0x68] sm:$0xff]  ;;  %v2047_v61 = vld [vmem:[#allocation3 + $0x60] sm:$0xff] }
  0x14   :  { %3431 = vst [vmem:[#allocation7_spill] sm:$0xff] %v1977_v30  ;;  %v3295_v34 = vand.u32 4294901760, %v1966_v25  ;;  %115 = vmatprep.subr.mxu0 %v1935_v10  ;;  %v228_v38 = vsub.f32 %v1947_v18, %v3298_v29  ;;  %v3293_v39 = vand.u32 4294901760, %v1980_v31  ;;  %v2002_v40 = vsub.f32 %v62_v8, %v1937_v11  ;;  %v2059_v2 = vld [vmem:[#allocation3 + $0x58] sm:$0xff] }
  0x15   :  { %3432 = vst [vmem:[#allocation8_spill] sm:$0xff] %v1983_v32  ;;  %3433 = vst [vmem:[#allocation9_spill] sm:$0xff] %v1992_v36  ;;  %v2005_v41 = vand.u32 4294901760, %v1972_v28  ;;  %117 = vmatpush1.msra.mxu0 %v1937_v11  ;;  %v234_v42 = vsub.f32 %v1960_v23, %v3296_v33  ;;  %v3291_v44 = vand.u32 4294901760, %v1989_v35  ;;  %v2016_v45 = vsub.f32 %v61_v12, %v1940_v15 }
  0x16   :  { %v240_v43 = vsub.f32 %v1966_v25, %v3295_v34  ;;  %119 = vmatprep.subr.mxu0 %v1940_v15  ;;  %v229_v47 = vand.u32 4294901760, %v228_v38  ;;  %v246_v48 = vsub.f32 %v1980_v31, %v3293_v39  ;;  %v3290_v49 = vand.u32 4294901760, %v2002_v40  ;;  %v2150_v39 = vld [vmem:[#allocation3 + $0x28] sm:$0xff]  ;;  %v2160_v34 = vld [vmem:[#allocation3 + $0x20] sm:$0xff] }
  0x17   :  { %3434 = vst [vmem:[#allocation10_spill] sm:$0xff] %v2005_v41  ;;  %v2026_v50 = vand.u32 4294901760, %v1994_v37  ;;  %121 = vmatpush1.msra.mxu0 %v1942_v16  ;;  %v235_v52 = vand.u32 4294901760, %v234_v42  ;;  %v252_v54 = vsub.f32 %v1989_v35, %v3291_v44  ;;  %v3288_v55 = vand.u32 4294901760, %v2016_v45 }
  0x18   :  { %v241_v53 = vand.u32 4294901760, %v240_v43  ;;  %123 = vmatprep.subr.mxu0 %v1944_v17  ;;  %230 = vmatprep.subr.mxu1 %v229_v47  ;;  %v247_v57 = vand.u32 4294901760, %v246_v48  ;;  %v258_v58 = vsub.f32 %v2002_v40, %v3290_v49  ;;  %v2042_v59 = vsub.f32 %v60_v13, %v1942_v16  ;;  %v2070_v13 = vld [vmem:[#allocation3 + $0x50] sm:$0xff] }
  0x19   :  { %3435 = vst [vmem:[#allocation11_spill] sm:$0xff] %v2026_v50  ;;  %v2045_v60 = vand.u32 4294901760, %v2018_v46  ;;  %125 = vmatpush1.msra.mxu0 %v1957_v22  ;;  %236 = vmatpush1.msra.mxu1 %v235_v52  ;;  %v253_v62 = vand.u32 4294901760, %v252_v54  ;;  %v264_v63 = vsub.f32 %v2016_v45, %v3288_v55  ;;  %v2054_v0 = vsub.f32 %v59_v14, %v1944_v17  ;;  %v2137_v49 = vld [vmem:[#allocation3 + $0x30] sm:$0xff] }
  0x1a   :  { %v2057_v1 = vand.u32 4294901760, %v2028_v51  ;;  %127 = vmatprep.subr.mxu0 %v1963_v24  ;;  %242 = vmatprep.subr.mxu1 %v241_v53  ;;  %v259_v6 = vand.u32 4294901760, %v258_v58  ;;  %v3286_v7 = vand.u32 4294901760, %v2042_v59  ;;  %v2065_v8 = vsub.f32 %v1949_v19, %v1957_v22 }
  0x1b   :  { %3436 = vst [vmem:[#allocation12_spill] sm:$0xff] %v2045_v60  ;;  %v2068_v12 = vand.u32 4294901760, %v2035_v56  ;;  %129 = vmatpush1.msra.mxu0 %v1977_v30  ;;  %248 = vmatpush1.msra.mxu1 %v247_v57  ;;  %v265_v14 = vand.u32 4294901760, %v264_v63  ;;  %v3285_v38 = vand.u32 4294901760, %v2054_v0  ;;  %v2076_v42 = vsub.f32 %v1951_v20, %v1963_v24  ;;  %v2093_v20 = vld [vmem:[#allocation3 + $0x48] sm:$0xff] }
  0x1c   :  { %3437 = vst [vmem:[#allocation13_spill] sm:$0xff] %v2057_v1  ;;  %v2079_v43 = vand.u32 4294901760, %v2047_v61  ;;  %131 = vmatprep.subr.mxu0 %v1983_v32  ;;  %254 = vmatprep.subr.mxu1 %v253_v62  ;;  %v270_v19 = vsub.f32 %v2042_v59, %v3286_v7  ;;  %v3287_v47 = vand.u32 4294901760, %v2065_v8  ;;  %v2088_v48 = vsub.f32 %v1953_v21, %v1977_v30 }
  0x1d   :  { %3438 = vst [vmem:[#allocation14_spill] sm:$0xff] %v2068_v12  ;;  %v2091_v52 = vand.u32 4294901760, %v2059_v2  ;;  %133 = vmatpush1.msra.mxu0 %v1992_v36  ;;  %260 = vmatpush1.msra.mxu1 %v259_v6  ;;  %v276_v53 = vsub.f32 %v2054_v0, %v3285_v38  ;;  %v3289_v54 = vand.u32 4294901760, %v2076_v42  ;;  %v2102_v57 = vsub.f32 %v1968_v26, %v1983_v32  ;;  %v2116_v38 = vld [vmem:[#allocation3 + $0x40] sm:$0xff] }
  0x1e   :  { %3439 = vst [vmem:[#allocation15_spill] sm:$0xff] %v2079_v43  ;;  %v2105_v21 = vand.u32 4294901760, %v2070_v13  ;;  %135 = vmatprep.subr.mxu0 %v2005_v41  ;;  %266 = vmatprep.subr.mxu1 %v265_v14  ;;  %v271_v58 = vand.u32 4294901760, %v270_v19  ;;  %v282_v62 = vsub.f32 %v2065_v8, %v3287_v47  ;;  %v3292_v63 = vand.u32 4294901760, %v2088_v48  ;;  %v2126_v47 = vld [vmem:[#allocation3 + $0x38] sm:$0xff] }
  0x1f   :  { %3440 = vst [vmem:[#allocation16_spill] sm:$0xff] %v2091_v52  ;;  %v2114_v6 = vsub.f32 %v1970_v27, %v1992_v36  ;;  %137 = vmatpush1.msra.mxu0 %v2026_v50  ;;  %v277_v26 = vand.u32 4294901760, %v276_v53  ;;  %v288_v14 = vsub.f32 %v2076_v42, %v3289_v54  ;;  %v3294_v19 = vand.u32 4294901760, %v2102_v57  ;;  %v73_v36 = vld [vmem:[#allocation3 + $0x128] sm:$0x3f] }
  0x20   :  { %3441 = vst [vmem:[#allocation17_spill] sm:$0xff] %v2105_v21  ;;  %v2124_v7 = vand.u32 4294901760, %v2093_v20  ;;  %272 = vmatpush1.msra.mxu1 %v271_v58  ;;  %139 = vmatprep.subr.mxu0 %v2045_v60  ;;  %v283_v27 = vand.u32 4294901760, %v282_v62  ;;  %v294_v55 = vsub.f32 %v2088_v48, %v3292_v63  ;;  %v2135_v54 = vsub.f32 %v1972_v28, %v2005_v41 }
  0x21   :  { %v3297_v53 = vand.u32 4294901760, %v2114_v6  ;;  %278 = vmatprep.subr.mxu1 %v277_v26  ;;  %141 = vmatpush1.msra.mxu0 %v2057_v1  ;;  %v289_v44 = vand.u32 4294901760, %v288_v14  ;;  %v300_v58 = vsub.f32 %v2102_v57, %v3294_v19  ;;  %v2144_v62 = vand.u32 4294901760, %v2116_v38 }
  0x22   :  { %3442 = vst [vmem:[#allocation18_spill] sm:$0xff] %v2124_v7  ;;  %v2148_v63 = vsub.f32 %v1994_v37, %v2026_v50  ;;  %284 = vmatpush1.msra.mxu1 %v283_v27  ;;  %143 = vmatprep.subr.mxu0 %v2068_v12  ;;  %v295_v28 = vand.u32 4294901760, %v294_v55  ;;  %v3301_v14 = vand.u32 4294901760, %v2135_v54  ;;  %v2158_v19 = vand.u32 4294901760, %v2126_v47 }
  0x23   :  { %3443 = vst [vmem:[#allocation19_spill] sm:$0xff] %v2144_v62  ;;  %v306_v26 = vsub.f32 %v2114_v6, %v3297_v53  ;;  %290 = vmatprep.subr.mxu1 %v289_v44  ;;  %145 = vmatpush1.msra.mxu0 %v2079_v43  ;;  %v301_v37 = vand.u32 4294901760, %v300_v58  ;;  %v2166_v55 = vsub.f32 %v2018_v46, %v2045_v60  ;;  %v2169_v33 = vand.u32 4294901760, %v2137_v49  ;;  %v2171_v53 = vld [vmem:[#allocation3 + $0x18] sm:$0xff] }
  0x24   :  { %3444 = vst [vmem:[#allocation20_spill] sm:$0xff] %v2158_v19  ;;  %v3304_v27 = vand.u32 4294901760, %v2148_v63  ;;  %296 = vmatpush1.msra.mxu1 %v295_v28  ;;  %147 = vmatprep.subr.mxu0 %v2091_v52  ;;  %v312_v44 = vsub.f32 %v2135_v54, %v3301_v14  ;;  %v2179_v58 = vsub.f32 %v2028_v51, %v2057_v1  ;;  %v2182_v46 = vand.u32 4294901760, %v2150_v39  ;;  %v2196_v51 = vld [vmem:[#allocation3 + $0x10] sm:$0xff] }
  0x25   :  { %3445 = vst [vmem:[#allocation21_spill] sm:$0xff] %v2169_v33  ;;  %v307_v29 = vand.u32 4294901760, %v306_v26  ;;  %302 = vmatprep.subr.mxu1 %v301_v37  ;;  %149 = vmatpush1.msra.mxu0 %v2105_v21  ;;  %v2191_v60 = vsub.f32 %v2035_v56, %v2068_v12  ;;  %v2194_v14 = vand.u32 4294901760, %v2160_v34  ;;  %v2205_v26 = vand.u32 4294901760, %v2171_v53  ;;  %v2207_v56 = vld [vmem:[#allocation3 + $0x8] sm:$0xff] }
  0x26   :  { %3446 = vst [vmem:[#allocation22_spill] sm:$0xff] %v2182_v46  ;;  %v318_v28 = vsub.f32 %v2148_v63, %v3304_v27  ;;  %151 = vmatprep.subr.mxu0 %v2124_v7  ;;  %v313_v37 = vand.u32 4294901760, %v312_v44  ;;  %v2202_v27 = vsub.f32 %v2047_v61, %v2079_v43  ;;  %v3450_v50 = vand.u32 4294901760, %v2166_v55  ;;  %v2230_v44 = vld [vmem:[#allocation3] sm:$0xff] }
  0x27   :  { %3447 = vst [vmem:[#allocation23_spill] sm:$0xff] %v2194_v14  ;;  %308 = vmatpush1.msra.mxu1 %v307_v29  ;;  %3449 = vst [vmem:[#allocation25_spill] sm:$0xff] %v2205_v26  ;;  %153 = vmatpush1.msra.mxu0 %v2144_v62  ;;  %v2216_v1 = vsub.f32 %v2059_v2, %v2091_v52  ;;  %v3452_v61 = vand.u32 4294901760, %v2179_v58  ;;  %v2238_v41 = vand.u32 4294901760, %v2207_v56  ;;  %v2254_v30 = vand.u32 4294901760, %v2230_v44 }
  0x28   :  { %3448 = vst [vmem:[#allocation24_spill] sm:$0xff] %v2202_v27  ;;  %v319_v12 = vand.u32 4294901760, %v318_v28  ;;  %v324_v29 = vsub.f32 %v2166_v55, %v3450_v50  ;;  %314 = vmatprep.subr.mxu1 %v313_v37  ;;  %155 = vmatprep.subr.mxu0 %v2158_v19  ;;  %v2224_v28 = vand.u32 4294901760, %v2196_v51  ;;  %v2228_v50 = vsub.f32 %v2070_v13, %v2105_v21 }
  0x29   :  { %3451 = vst [vmem:[#allocation26_spill] sm:$0xff] %v2216_v1  ;;  %v330_v43 = vsub.f32 %v2179_v58, %v3452_v61  ;;  %157 = vmatpush1.msra.mxu0 %v2169_v33  ;;  %v3455_v37 = vand.u32 4294901760, %v2191_v60  ;;  %v3325_v61 = vand.u32 4294901760, %v2216_v1  ;;  %3456 = vst [vmem:[#allocation29_spill] sm:$0xff] %v2238_v41  ;;  %v3457_v13 = vand.u32 4294901760, %v2202_v27 }
  0x2a   :  { %3453 = vst [vmem:[#allocation27_spill] sm:$0xff] %v2224_v28  ;;  %3454 = vst [vmem:[#allocation28_spill] sm:$0xff] %v2228_v50  ;;  %320 = vmatpush1.msra.mxu1 %v319_v12  ;;  %v325_v2 = vand.u32 4294901760, %v324_v29  ;;  %159 = vmatprep.subr.mxu0 %v2182_v46  ;;  %v2247_v21 = vsub.f32 %v2093_v20, %v2124_v7  ;;  %v72_v29 = vld [vmem:[#allocation3 + $0x120] sm:$0x3f]  ;;  %v2281_v7 = vld [vmem:[#allocation3 + $0x108] sm:$0xff] }
  0x2b   :  { %v336_v52 = vsub.f32 %v2191_v60, %v3455_v37  ;;  %v331_v32 = vand.u32 4294901760, %v330_v43  ;;  %v342_v12 = vsub.f32 %v2202_v27, %v3457_v13  ;;  %161 = vmatpush1.msra.mxu0 %v2194_v14  ;;  %v348_v43 = vsub.f32 %v2216_v1, %v3325_v61  ;;  %v2268_v1 = vld [vmem:[#allocation3 + $0x118] sm:$0xff] }
  0x2c   :  { %3458 = vst [vmem:[#allocation30_spill] sm:$0xff] %v2247_v21  ;;  %326 = vmatprep.subr.mxu1 %v325_v2  ;;  %v2258_v13 = vsub.f32 %v2116_v38, %v2144_v62  ;;  %163 = vmatprep.subr.mxu0 %v2205_v26  ;;  %v2266_v61 = vsel %vm99_vm0, %v73_v36, 0  ;;  %v2292_v62 = vsub.f32 %v2137_v49, %v2169_v33  ;;  %v2308_v49 = vld [vmem:[#allocation3 + $0x100] sm:$0xff]  ;;  %vm1856_vm3 = vcmask 1024  }
  0x2d   :  { %v337_v37 = vand.u32 4294901760, %v336_v52  ;;  %332 = vmatpush1.msra.mxu1 %v331_v32  ;;  %v343_v20 = vand.u32 4294901760, %v342_v12  ;;  %v3460_v52 = vand.u32 4294901760, %v2228_v50  ;;  %v349_v27 = vand.u32 4294901760, %v348_v43  ;;  %165 = vmatpush1.msra.mxu0 %v2224_v28 }
  0x2e   :  { %3459 = vst [vmem:[#allocation31_spill] sm:$0xff] %v2258_v13  ;;  %v2273_v38 = vand.u32 4294901760, %v2266_v61  ;;  %v2277_v12 = vsub.f32 %v2126_v47, %v2158_v19  ;;  %167 = vmatprep.subr.mxu0 %v2238_v41  ;;  %v2288_v32 = vsel %vm99_vm0, %v72_v29, 0  ;;  %3462 = vst [vmem:[#allocation32_spill] sm:$0xff] %v2292_v62  ;;  %v2306_v19 = vand.u32 4294901760, %v2268_v1 }
  0x2f   :  { %v354_v2 = vsub.f32 %v2228_v50, %v3460_v52  ;;  %338 = vmatprep.subr.mxu1 %v337_v37  ;;  %v2279_v52 = vld [vmem:[#allocation3 + $0x110] sm:$0xff]  ;;  %v3461_v37 = vand.u32 4294901760, %v2247_v21  ;;  %v1863_v47 = vld.sshfl [vmem:[%s3279_s0] sm:$0x33 pattern:$0x76325410]  ;;  %169 = vmatpush1.msra.mxu0 %v2254_v30 }
  0x30   :  { %344 = vmatpush1.msra.mxu1 %v343_v20  ;;  %v3463_v20 = vand.u32 4294901760, %v2258_v13  ;;  %v2303_v29 = vand.u32 4294901760, %v2288_v32  ;;  %3464 = vst [vmem:[#allocation33_spill] sm:$0xff] %v2306_v19  ;;  %197 = vmatprep.subr.mxu0 %v2273_v38 }
  0x31   :  { %v355_v36 = vand.u32 4294901760, %v354_v2  ;;  %v360_v43 = vsub.f32 %v2247_v21, %v3461_v37  ;;  %350 = vmatprep.subr.mxu1 %v349_v27  ;;  %v3344_v27 = vand.u32 4294901760, %v2292_v62  ;;  %v2314_v21 = vsub.f32 %v2150_v39, %v2182_v46 }
  0x32   :  { %v366_v2 = vsub.f32 %v2258_v13, %v3463_v20  ;;  %v2317_v20 = vand.u32 4294901760, %v2279_v52  ;;  %v3467_v13 = vand.u32 4294901760, %v2277_v12  ;;  %199 = vmatpush2.msra.mxu0 %v2303_v29  ;;  %v2340_v46 = vand.u32 4294901760, %v2308_v49 }
  0x33   :  { %356 = vmatpush1.msra.mxu1 %v355_v36  ;;  %v361_v33 = vand.u32 4294901760, %v360_v43  ;;  %3465 = vst [vmem:[#allocation34_spill] sm:$0xff] %v2314_v21  ;;  %v2325_v36 = vsub.f32 %v2160_v34, %v2194_v14  ;;  %v2328_v43 = vand.u32 4294901760, %v2281_v7  ;;  %v378_v39 = vsub.f32 %v2292_v62, %v3344_v27  ;;  %201 = vmatprep.subr.mxu0 %v2306_v19 }
  0x34   :  { %3466 = vst [vmem:[#allocation35_spill] sm:$0xff] %v2317_v20  ;;  %v367_v37 = vand.u32 4294901760, %v366_v2  ;;  %v372_v50 = vsub.f32 %v2277_v12, %v3467_v13  ;;  %v3351_v2 = vand.u32 4294901760, %v2314_v21  ;;  %v2337_v13 = vsub.f32 %v2171_v53, %v2205_v26  ;;  %203 = vmatpush2.msra.mxu0 %v2317_v20 }
  0x35   :  { %3468 = vst [vmem:[#allocation36_spill] sm:$0xff] %v2325_v36  ;;  %362 = vmatprep.subr.mxu1 %v361_v33  ;;  %v3356_v33 = vand.u32 4294901760, %v2325_v36  ;;  %v2346_v27 = vsub.f32 %v2196_v51, %v2224_v28  ;;  %v94_v14 = vcombine.high %v1863_v47, %v1863_v47  ;;  %v379_v62 = vand.u32 4294901760, %v378_v39  ;;  %205 = vmatprep.subr.mxu0 %v2328_v43 }
  0x36   :  { %368 = vmatpush1.msra.mxu1 %v367_v37  ;;  %v373_v34 = vand.u32 4294901760, %v372_v50  ;;  %v384_v53 = vsub.f32 %v2314_v21, %v3351_v2  ;;  %v3359_v26 = vand.u32 4294901760, %v2337_v13  ;;  %v2353_v37 = vand.u32 4294901760, %v1863_v47  ;;  %207 = vmatpush2.msra.mxu0 %v2340_v46 }
  0x37   :  { %v390_v50 = vsub.f32 %v2325_v36, %v3356_v33  ;;  %v97_v39 = vsel %vm96_vm1, %v94_v14, 0  ;;  %v2363_v2 = vsub.f32 %v2207_v56, %v2238_v41  ;;  %490 = vmatprep.subr.mxu0 %v1947_v18  ;;  %v3471_v14 = vand.u32 4294901760, %v2346_v27 }
  0x38   :  { %3469 = vst [vmem:[#allocation37_spill] sm:$0xff] %v2353_v37  ;;  %374 = vmatprep.subr.mxu1 %v373_v34  ;;  %v385_v28 = vand.u32 4294901760, %v384_v53  ;;  %v396_v34 = vsub.f32 %v2337_v13, %v3359_v26  ;;  %v2368_v21 = vand.u32 4294901760, %v97_v39  ;;  %v2372_v33 = vsub.f32 %v1863_v47, %v2353_v37 }
  0x39   :  { %380 = vmatpush1.msra.mxu1 %v379_v62  ;;  %v391_v51 = vand.u32 4294901760, %v390_v50  ;;  %v402_v36 = vsub.f32 %v2346_v27, %v3471_v14  ;;  %v3361_v56 = vand.u32 4294901760, %v2363_v2  ;;  %v2380_v62 = vsub.f32 %v2230_v44, %v2254_v30 }
  0x3a   :  { %3470 = vst [vmem:[#allocation38_spill] sm:$0xff] %v2368_v21  ;;  %386 = vmatprep.subr.mxu1 %v385_v28  ;;  %v397_v53 = vand.u32 4294901760, %v396_v34  ;;  %v2383_v26 = vsub.f32 %v97_v39, %v2368_v21  ;;  %v3362_v18 = vand.u32 4294901760, %v2372_v33  ;;  %v2388_v47 = vsub.f32 %v2266_v61, %v2273_v38  ;;  %480 = vmatprep.mubr.f32.mxu1 %v2368_v21 }
  0x3b   :  { %392 = vmatpush1.msra.mxu1 %v391_v51  ;;  %v403_v50 = vand.u32 4294901760, %v402_v36  ;;  %v408_v44 = vsub.f32 %v2363_v2, %v3361_v56  ;;  %v3365_v28 = vand.u32 4294901760, %v2380_v62  ;;  %v2397_v39 = vsub.f32 %v2288_v32, %v2303_v29 }
  0x3c   :  { %398 = vmatprep.subr.mxu1 %v397_v53  ;;  %v3368_v34 = vand.u32 4294901760, %v2383_v26  ;;  %v217_v61 = vsub.f32 %v2372_v33, %v3362_v18  ;;  %v2406_v36 = vsub.f32 %v2268_v1, %v2306_v19  ;;  %v2414_v56 = vsub.f32 %v2279_v52, %v2317_v20 }
  0x3d   :  { %404 = vmatpush1.msra.mxu1 %v403_v50  ;;  %v409_v14 = vand.u32 4294901760, %v408_v44  ;;  %v414_v32 = vsub.f32 %v2380_v62, %v3365_v28  ;;  %v3369_v53 = vand.u32 4294901760, %v2397_v39  ;;  %v3472_v1 = vand.u32 4294901760, %v2388_v47 }
  0x3e   :  { %v211_v18 = vsub.f32 %v2383_v26, %v3368_v34  ;;  %v218_v51 = vand.u32 4294901760, %v217_v61  ;;  %v3375_v44 = vand.u32 4294901760, %v2406_v36  ;;  %v3374_v52 = vand.u32 4294901760, %v2414_v56 }
  0x3f   :  { %v446_v50 = vsub.f32 %v2388_v47, %v3472_v1  ;;  %410 = vmatprep.subr.mxu1 %v409_v14  ;;  %v415_v21 = vand.u32 4294901760, %v414_v32  ;;  %v452_v28 = vsub.f32 %v2397_v39, %v3369_v53  ;;  %v2429_v20 = vsub.f32 %v2281_v7, %v2328_v43 }
  0x40   :  { %v212_v34 = vand.u32 4294901760, %v211_v18  ;;  %v458_v1 = vsub.f32 %v2406_v36, %v3375_v44  ;;  %v2436_v14 = vsub.f32 %v2308_v49, %v2340_v46  ;;  %v464_v53 = vsub.f32 %v2414_v56, %v3374_v52  ;;  %v3486_v52 = vld [vmem:[#allocation14_spill] sm:$0xff] }
  0x41   :  { %v447_v61 = vand.u32 4294901760, %v446_v50  ;;  %416 = vmatpush1.msra.mxu1 %v415_v21  ;;  %v453_v32 = vand.u32 4294901760, %v452_v28  ;;  %v3373_v19 = vand.u32 4294901760, %v2429_v20  ;;  %v3487_v44 = vld [vmem:[#allocation34_spill] sm:$0xff] }
  0x42   :  { %213 = vmatprep.mubr.f32.mxu0 %v212_v34  ;;  %v459_v18 = vand.u32 4294901760, %v458_v1  ;;  %v3372_v7 = vand.u32 4294901760, %v2436_v14  ;;  %v465_v50 = vand.u32 4294901760, %v464_v53  ;;  %v3474_v53 = vld [vmem:[#allocation24_spill] sm:$0xff]  ;;  %v3476_v1 = vld [vmem:[#allocation26_spill] sm:$0xff] }
  0x43   :  { %448 = vmatprep.subr.mxu1 %v447_v61  ;;  %219 = vmatmul.mubr.f32.vlgmr.msra.gmra.mxu0 %v218_v51  ;;  %v470_v49 = vsub.f32 %v2429_v20, %v3373_v19  ;;  %v3473_v51 = vld [vmem:[#allocation7_spill] sm:$0xff]  ;;  %v3475_v61 = vld [vmem:[#allocation8_spill] sm:$0xff] }
  0x44   :  { %454 = vmatpush2.msra.mxu1 %v453_v32  ;;  %493 = vmatpush1.msra.mxu0 %v1960_v23  ;;  %v476_v21 = vsub.f32 %v2436_v14, %v3372_v7  ;;  %v3477_v32 = vld [vmem:[#allocation9_spill] sm:$0xff]  ;;  %v3485_v19 = vld [vmem:[#allocation32_spill] sm:$0xff] }
  0x45   :  { %460 = vmatprep.subr.mxu1 %v459_v18  ;;  %496 = vmatprep.subr.mxu0 %v1966_v25  ;;  %v471_v28 = vand.u32 4294901760, %v470_v49  ;;  %v3478_v18 = vld [vmem:[#allocation28_spill] sm:$0xff]  ;;  %v3480_v49 = vld [vmem:[#allocation30_spill] sm:$0xff]  ;;  %v3484_v7 = vld [vmem:[#allocation13_spill] sm:$0xff] }
  0x46   :  { %466 = vmatpush2.msra.mxu1 %v465_v50  ;;  %499 = vmatpush1.msra.mxu0 %v1980_v31  ;;  %v477_v34 = vand.u32 4294901760, %v476_v21  ;;  %v3479_v50 = vld [vmem:[#allocation10_spill] sm:$0xff]  ;;  %v3481_v21 = vld [vmem:[#allocation11_spill] sm:$0xff] }
  0x47   :  { %630 = vmatprep.mubr.f32.mxu0 %v2383_v26  ;;  %502 = vmatprep.subr.mxu0 %v1989_v35 }
  0x48   :  { %472 = vmatprep.subr.mxu1 %v471_v28  ;;  %505 = vmatpush1.msra.mxu0 %v2002_v40  ;;  %v3482_v28 = vld [vmem:[#allocation31_spill] sm:$0xff] }
  0x49   :  { %478 = vmatpush2.msra.mxu1 %v477_v34  ;;  %508 = vmatprep.subr.mxu0 %v2016_v45  ;;  %v3483_v34 = vld [vmem:[#allocation12_spill] sm:$0xff] }
  0x4a   :  { %482 = vmatmul.mubr.f32.vlgmr.msra.gmra.mxu1 %v2353_v37  ;;  %511 = vmatpush1.msra.mxu0 %v2042_v59  ;;  %v3488_v37 = vld [vmem:[#allocation15_spill] sm:$0xff] }
  0x4b   :  { %640 = vmatprep.subr.mxu1 %v1927_v3  ;;  %514 = vmatprep.subr.mxu0 %v2054_v0 }
  0x4c   :  { %642 = vmatpush1.msra.mxu1 %v1929_v4  ;;  %517 = vmatpush1.msra.mxu0 %v2065_v8 }
  0x4d   :  { %644 = vmatprep.subr.mxu1 %v1931_v5  ;;  %520 = vmatprep.subr.mxu0 %v2076_v42 }
  0x4e   :  { %646 = vmatpush1.msra.mxu1 %v1933_v9  ;;  %523 = vmatpush1.msra.mxu0 %v2088_v48 }
  0x4f   :  { %648 = vmatprep.subr.mxu1 %v1935_v10  ;;  %526 = vmatprep.subr.mxu0 %v2102_v57 }
  0x50   :  { %650 = vmatpush1.msra.mxu1 %v1937_v11  ;;  %529 = vmatpush1.msra.mxu0 %v2114_v6 }
  0x51   :  { %652 = vmatprep.subr.mxu1 %v1940_v15  ;;  %532 = vmatprep.subr.mxu0 %v2135_v54 }
  0x52   :  { %654 = vmatpush1.msra.mxu1 %v1942_v16  ;;  %535 = vmatpush1.msra.mxu0 %v2148_v63 }
  0x53   :  { %656 = vmatprep.subr.mxu1 %v1944_v17  ;;  %538 = vmatprep.subr.mxu0 %v2166_v55 }
  0x54   :  { %658 = vmatpush1.msra.mxu1 %v1957_v22  ;;  %541 = vmatpush1.msra.mxu0 %v2179_v58 }
  0x55   :  { %660 = vmatprep.subr.mxu1 %v1963_v24  ;;  %544 = vmatprep.subr.mxu0 %v2191_v60 }
  0x56   :  { %662 = vmatpush1.msra.mxu1 %v3473_v51  ;;  %547 = vmatpush1.msra.mxu0 %v3474_v53 }
  0x57   :  { %664 = vmatprep.subr.mxu1 %v3475_v61  ;;  %550 = vmatprep.subr.mxu0 %v3476_v1 }
  0x58   :  { %666 = vmatpush1.msra.mxu1 %v3477_v32  ;;  %553 = vmatpush1.msra.mxu0 %v3478_v18 }
  0x59   :  { %668 = vmatprep.subr.mxu1 %v3479_v50  ;;  %556 = vmatprep.subr.mxu0 %v3480_v49  ;;  %v3489_v50 = vld [vmem:[#allocation36_spill] sm:$0xff] }
  0x5a   :  { %670 = vmatpush1.msra.mxu1 %v3481_v21  ;;  %559 = vmatpush1.msra.mxu0 %v3482_v28  ;;  %v3490_v49 = vld [vmem:[#allocation16_spill] sm:$0xff]  ;;  %v3491_v21 = vld [vmem:[#allocation17_spill] sm:$0xff] }
  0x5b   :  { %672 = vmatprep.subr.mxu1 %v3483_v34  ;;  %562 = vmatprep.subr.mxu0 %v2277_v12  ;;  %v3492_v34 = vld [vmem:[#allocation18_spill] sm:$0xff] }
  0x5c   :  { %674 = vmatpush1.msra.mxu1 %v3484_v7  ;;  %565 = vmatpush1.msra.mxu0 %v3485_v19  ;;  %v3493_v7 = vld [vmem:[#allocation19_spill] sm:$0xff] }
  0x5d   :  { %676 = vmatprep.subr.mxu1 %v3486_v52  ;;  %568 = vmatprep.subr.mxu0 %v3487_v44  ;;  %v3494_v52 = vld [vmem:[#allocation20_spill] sm:$0xff] }
  0x5e   :  { %678 = vmatpush1.msra.mxu1 %v3488_v37  ;;  %571 = vmatpush1.msra.mxu0 %v3489_v50  ;;  %v3495_v37 = vld [vmem:[#allocation21_spill] sm:$0xff] }
  0x5f   :  { %680 = vmatprep.subr.mxu1 %v3490_v49  ;;  %574 = vmatprep.subr.mxu0 %v2337_v13  ;;  %v3496_v49 = vld [vmem:[#allocation22_spill] sm:$0xff] }
  0x60   :  { %682 = vmatpush1.msra.mxu1 %v3491_v21  ;;  %577 = vmatpush1.msra.mxu0 %v2346_v27  ;;  %v3497_v21 = vld [vmem:[#allocation23_spill] sm:$0xff] }
  0x61   :  { %684 = vmatprep.subr.mxu1 %v3492_v34  ;;  %580 = vmatprep.subr.mxu0 %v2363_v2  ;;  %v3498_v34 = vld [vmem:[#allocation25_spill] sm:$0xff] }
  0x62   :  { %686 = vmatpush1.msra.mxu1 %v3493_v7  ;;  %583 = vmatpush1.msra.mxu0 %v2380_v62  ;;  %v3499_v7 = vld [vmem:[#allocation27_spill] sm:$0xff] }
  0x63   :  { %688 = vmatprep.subr.mxu1 %v3494_v52  ;;  %612 = vmatprep.subr.mxu0 %v2388_v47 }
  0x64   :  { %690 = vmatpush1.msra.mxu1 %v3495_v37  ;;  %615 = vmatpush2.msra.mxu0 %v2397_v39  ;;  %v3500_v37 = vld [vmem:[#allocation6_spill] sm:$0xff] }
  0x65   :  { %692 = vmatprep.subr.mxu1 %v3496_v49  ;;  %618 = vmatprep.subr.mxu0 %v2406_v36  ;;  %v3501_v49 = vand.u32 4294901760, %v3500_v37  ;;  %v3506_v37 = vand.u32 4294901760, %v1989_v35  ;;  %v3512_v35 = vand.u32 4294901760, %v2372_v33 }
  0x66   :  { %694 = vmatpush1.msra.mxu1 %v3497_v21  ;;  %621 = vmatpush2.msra.mxu0 %v2414_v56  ;;  %v3502_v21 = vand.u32 4294901760, %v1960_v23  ;;  %v3508_v23 = vand.u32 4294901760, %v2002_v40  ;;  %v3514_v40 = vand.u32 4294901760, %v2065_v8  ;;  %v3529_v8 = vld [vmem:[#allocation10_spill] sm:$0xff] }
  0x67   :  { %696 = vmatprep.subr.mxu1 %v3498_v34  ;;  %624 = vmatprep.subr.mxu0 %v2429_v20  ;;  %v3503_v34 = vand.u32 4294901760, %v1966_v25  ;;  %v3509_v25 = vand.u32 4294901760, %v2016_v45  ;;  %v3515_v45 = vand.u32 4294901760, %v2076_v42  ;;  %v3531_v42 = vld [vmem:[#allocation11_spill] sm:$0xff] }
  0x68   :  { %698 = vmatpush1.msra.mxu1 %v3499_v7  ;;  %627 = vmatpush2.msra.mxu0 %v2436_v14  ;;  %v3504_v7 = vand.u32 4294901760, %v1980_v31  ;;  %v3510_v31 = vand.u32 4294901760, %v2383_v26  ;;  %v3539_v26 = vld [vmem:[#allocation15_spill] sm:$0xff] }
  0x69   :  { %700 = vmatprep.subr.mxu1 %v2238_v41  ;;  %633 = vmatmul.mubr.f32.vlgmr.msra.gmra.mxu0 %v2372_v33  ;;  %v3505_v41 = vld [vmem:[#allocation33_spill] sm:$0xff]  ;;  %v3541_v33 = vld [vmem:[#allocation16_spill] sm:$0xff] }
  0x6a   :  { %757 = vmatprep.subr.mxu0 %v3501_v49  ;;  %702 = vmatpush1.msra.mxu1 %v2254_v30  ;;  %v3507_v49 = vld [vmem:[#allocation35_spill] sm:$0xff] }
  0x6b   :  { %761 = vmatpush1.msra.mxu0 %v3502_v21  ;;  %730 = vmatprep.subr.mxu1 %v2273_v38  ;;  %v3513_v21 = vand.u32 4294901760, %v2054_v0  ;;  %v3517_v0 = vand.u32 4294901760, %v2102_v57  ;;  %v3534_v57 = vand.u32 4294901760, %v3485_v19  ;;  %v3542_v19 = vand.u32 4294901760, %v2346_v27 }
  0x6c   :  { %765 = vmatprep.subr.mxu0 %v3503_v34  ;;  %732 = vmatpush2.msra.mxu1 %v2303_v29  ;;  %v3549_v27 = vand.u32 4294901760, %v2397_v39  ;;  %v3557_v39 = vand.u32 4294901760, %v2436_v14  ;;  %v3559_v34 = vld [vmem:[#allocation27_spill] sm:$0xff] }
  0x6d   :  { %769 = vmatpush1.msra.mxu0 %v3504_v7  ;;  %734 = vmatprep.subr.mxu1 %v3505_v41  ;;  %v3511_v7 = vand.u32 4294901760, %v2042_v59  ;;  %v3516_v59 = vand.u32 4294901760, %v2088_v48  ;;  %v3532_v48 = vand.u32 4294901760, %v2277_v12  ;;  %v3540_v12 = vand.u32 4294901760, %v2337_v13 }
  0x6e   :  { %773 = vmatprep.subr.mxu0 %v3506_v37  ;;  %736 = vmatpush2.msra.mxu1 %v3507_v49  ;;  %v3548_v13 = vand.u32 4294901760, %v2388_v47  ;;  %v3555_v47 = vand.u32 4294901760, %v2429_v20  ;;  %v3561_v37 = vld [vmem:[#allocation29_spill] sm:$0xff]  ;;  %v1069_v20 = vld [vmem:[%s3282_s3 + $0x78] sm:$0xff] }
  0x6f   :  { %777 = vmatpush1.msra.mxu0 %v3508_v23  ;;  %738 = vmatprep.subr.mxu1 %v2328_v43  ;;  %v1066_v23 = vld [vmem:[%s3282_s3 + $0x60] sm:$0xff] }
  0x70   :  { %781 = vmatprep.subr.mxu0 %v3509_v25  ;;  %740 = vmatpush2.msra.mxu1 %v2340_v46 }
  0x71   :  { %744 = vmatprep.mubr.f32.mxu1 %v3510_v31  ;;  %785 = vmatpush1.msra.mxu0 %v3511_v7 }
  0x72   :  { %748 = vmatmul.mubr.f32.vlgmr.msra.gmra.mxu1 %v3512_v35  ;;  %789 = vmatprep.subr.mxu0 %v3513_v21  ;;  %v2683_v35 = vand.u32 4294901760, %v1066_v23  ;;  %v1065_v21 = vld [vmem:[%s3282_s3 + $0x58] sm:$0xff] }
  0x73   :  { %942 = vmatprep.subr.mxu1 %v1927_v3  ;;  %793 = vmatpush1.msra.mxu0 %v3514_v40  ;;  %v3518_v3 = vand.u32 4294901760, %v2114_v6  ;;  %v3536_v6 = vand.u32 4294901760, %v3487_v44  ;;  %v3544_v44 = vand.u32 4294901760, %v2363_v2  ;;  %v3551_v2 = vand.u32 4294901760, %v2406_v36  ;;  %v3560_v36 = vld [vmem:[#allocation37_spill] sm:$0xff] }
  0x74   :  { %944 = vmatpush1.msra.mxu1 %v1929_v4  ;;  %797 = vmatprep.subr.mxu0 %v3515_v45  ;;  %v3519_v4 = vand.u32 4294901760, %v2135_v54  ;;  %v3533_v54 = vld [vmem:[#allocation12_spill] sm:$0xff] }
  0x75   :  { %946 = vmatprep.subr.mxu1 %v1931_v5  ;;  %801 = vmatpush1.msra.mxu0 %v3516_v59  ;;  %v3520_v5 = vand.u32 4294901760, %v2148_v63  ;;  %v3535_v63 = vld [vmem:[#allocation13_spill] sm:$0xff] }
  0x76   :  { %948 = vmatpush1.msra.mxu1 %v1933_v9  ;;  %805 = vmatprep.subr.mxu0 %v3517_v0  ;;  %v3521_v9 = vand.u32 4294901760, %v2166_v55  ;;  %v3537_v55 = vld [vmem:[#allocation14_spill] sm:$0xff]  ;;  %v2695_v0 = vsub.f32 %v1066_v23, %v2683_v35 }
  0x77   :  { %950 = vmatprep.subr.mxu1 %v1935_v10  ;;  %809 = vmatpush1.msra.mxu0 %v3518_v3  ;;  %v3522_v10 = vand.u32 4294901760, %v2179_v58  ;;  %v3538_v58 = vand.u32 4294901760, %v3489_v50  ;;  %v3554_v50 = vld [vmem:[#allocation23_spill] sm:$0xff]  ;;  %v2698_v3 = vand.u32 4294901760, %v1065_v21 }
  0x78   :  { %952 = vmatpush1.msra.mxu1 %v1937_v11  ;;  %813 = vmatprep.subr.mxu0 %v3519_v4  ;;  %v3523_v11 = vand.u32 4294901760, %v2191_v60  ;;  %v1064_v4 = vld [vmem:[%s3282_s3 + $0x50] sm:$0xff] }
  0x79   :  { %954 = vmatprep.subr.mxu1 %v1940_v15  ;;  %817 = vmatpush1.msra.mxu0 %v3520_v5  ;;  %v3524_v15 = vand.u32 4294901760, %v3474_v53  ;;  %v3545_v53 = vld [vmem:[#allocation18_spill] sm:$0xff] }
  0x7a   :  { %956 = vmatpush1.msra.mxu1 %v1942_v16  ;;  %821 = vmatprep.subr.mxu0 %v3521_v9  ;;  %v3525_v16 = vand.u32 4294901760, %v3476_v1  ;;  %v3547_v1 = vld [vmem:[#allocation19_spill] sm:$0xff] }
  0x7b   :  { %958 = vmatprep.subr.mxu1 %v1944_v17  ;;  %825 = vmatpush1.msra.mxu0 %v3522_v10  ;;  %v3526_v17 = vand.u32 4294901760, %v3478_v18  ;;  %v3552_v18 = vld [vmem:[#allocation22_spill] sm:$0xff]  ;;  %v3400_v10 = vand.u32 4294901760, %v2695_v0 }
  0x7c   :  { %960 = vmatpush1.msra.mxu1 %v1957_v22  ;;  %829 = vmatprep.subr.mxu0 %v3523_v11  ;;  %v3527_v22 = vld [vmem:[#allocation30_spill] sm:$0xff]  ;;  %v2708_v11 = vand.u32 4294901760, %v1064_v4 }
  0x7d   :  { %962 = vmatprep.subr.mxu1 %v1963_v24  ;;  %833 = vmatpush1.msra.mxu0 %v3524_v15  ;;  %v3528_v60 = vand.u32 4294901760, %v3527_v22  ;;  %v3530_v24 = vand.u32 4294901760, %v3482_v28  ;;  %v3556_v28 = vld [vmem:[#allocation25_spill] sm:$0xff]  ;;  %v2713_v15 = vsub.f32 %v1065_v21, %v2698_v3  ;;  %v1215_v22 = vsub.f32 %v2695_v0, %v3400_v10  ;;  %v1054_v21 = vld [vmem:[%s3282_s3] sm:$0xff] }
  0x7e   :  { %964 = vmatpush1.msra.mxu1 %v3473_v51  ;;  %837 = vmatprep.subr.mxu0 %v3525_v16  ;;  %v3543_v51 = vld [vmem:[#allocation17_spill] sm:$0xff] }
  0x7f   :  { %966 = vmatprep.subr.mxu1 %v3475_v61  ;;  %841 = vmatpush1.msra.mxu0 %v3526_v17  ;;  %v3546_v61 = vand.u32 4294901760, %v2380_v62  ;;  %v3553_v62 = vand.u32 4294901760, %v2414_v56  ;;  %v2652_v56 = vand.u32 4294901760, %v1069_v20  ;;  %v1063_v16 = vld [vmem:[%s3282_s3 + $0x48] sm:$0xff] }
  0x80   :  { %968 = vmatpush1.msra.mxu1 %v3477_v32  ;;  %845 = vmatprep.subr.mxu0 %v3528_v60  ;;  %v3550_v32 = vld [vmem:[#allocation21_spill] sm:$0xff]  ;;  %v2723_v60 = vsub.f32 %v1064_v4, %v2708_v11 }
  0x81   :  { %970 = vmatprep.subr.mxu1 %v3529_v8  ;;  %849 = vmatpush1.msra.mxu0 %v3530_v24  ;;  %v2725_v8 = vand.u32 4294901760, %v1063_v16  ;;  %v1062_v24 = vld [vmem:[%s3282_s3 + $0x40] sm:$0xff] }
  0x82   :  { %972 = vmatpush1.msra.mxu1 %v3531_v42  ;;  %853 = vmatprep.subr.mxu0 %v3532_v48  ;;  %v1061_v42 = vld [vmem:[%s3282_s3 + $0x38] sm:$0xff]  ;;  %v1060_v48 = vld [vmem:[%s3282_s3 + $0x30] sm:$0xff] }
  0x83   :  { %974 = vmatprep.subr.mxu1 %v3533_v54  ;;  %857 = vmatpush1.msra.mxu0 %v3534_v57  ;;  %v3396_v54 = vand.u32 4294901760, %v2713_v15  ;;  %v2739_v57 = vand.u32 4294901760, %v1062_v24 }
  0x84   :  { %976 = vmatpush1.msra.mxu1 %v3535_v63  ;;  %861 = vmatprep.subr.mxu0 %v3536_v6  ;;  %v2742_v63 = vand.u32 4294901760, %v1061_v42  ;;  %v2744_v6 = vand.u32 4294901760, %v1060_v48 }
  0x85   :  { %978 = vmatprep.subr.mxu1 %v3537_v55  ;;  %865 = vmatpush1.msra.mxu0 %v3538_v58  ;;  %v1059_v55 = vld [vmem:[%s3282_s3 + $0x28] sm:$0xff]  ;;  %v1058_v58 = vld [vmem:[%s3282_s3 + $0x20] sm:$0xff] }
  0x86   :  { %980 = vmatpush1.msra.mxu1 %v3539_v26  ;;  %869 = vmatprep.subr.mxu0 %v3540_v12  ;;  %v1216_v26 = vand.u32 4294901760, %v1215_v22  ;;  %v3394_v12 = vand.u32 4294901760, %v2723_v60 }
  0x87   :  { %982 = vmatprep.subr.mxu1 %v3541_v33  ;;  %873 = vmatpush1.msra.mxu0 %v3542_v19  ;;  %v2754_v33 = vsub.f32 %v1063_v16, %v2725_v8  ;;  %v2757_v19 = vand.u32 4294901760, %v1059_v55 }
  0x88   :  { %984 = vmatpush1.msra.mxu1 %v3543_v51  ;;  %877 = vmatprep.subr.mxu0 %v3544_v44  ;;  %v1222_v51 = vsub.f32 %v2713_v15, %v3396_v54  ;;  %v2764_v44 = vsub.f32 %v1062_v24, %v2739_v57 }
  0x89   :  { %986 = vmatprep.subr.mxu1 %v3545_v53  ;;  %881 = vmatpush1.msra.mxu0 %v3546_v61  ;;  %v2767_v53 = vsub.f32 %v1061_v42, %v2742_v63  ;;  %v2770_v61 = vand.u32 4294901760, %v1058_v58  ;;  %v2841_v42 = vand.u32 4294901760, %v1054_v21 }
  0x8a   :  { %988 = vmatpush1.msra.mxu1 %v3547_v1  ;;  %911 = vmatprep.subr.mxu0 %v3548_v13  ;;  %v1229_v1 = vsub.f32 %v2723_v60, %v3394_v12  ;;  %v3392_v13 = vand.u32 4294901760, %v2754_v33 }
  0x8b   :  { %990 = vmatprep.subr.mxu1 %v3494_v52  ;;  %915 = vmatpush2.msra.mxu0 %v3549_v27  ;;  %v3558_v52 = vld [vmem:[#allocation38_spill] sm:$0xff]  ;;  %v2778_v27 = vsub.f32 %v1060_v48, %v2744_v6 }
  0x8c   :  { %992 = vmatpush1.msra.mxu1 %v3550_v32  ;;  %919 = vmatprep.subr.mxu0 %v3551_v2  ;;  %v2781_v32 = vsub.f32 %v1059_v55, %v2757_v19  ;;  %v1057_v2 = vld [vmem:[%s3282_s3 + $0x18] sm:$0xff] }
  0x8d   :  { %994 = vmatprep.subr.mxu1 %v3552_v18  ;;  %923 = vmatpush2.msra.mxu0 %v3553_v62  ;;  %v1223_v18 = vand.u32 4294901760, %v1222_v51  ;;  %v3391_v62 = vand.u32 4294901760, %v2764_v44  ;;  %v2854_v51 = vsub.f32 %v1054_v21, %v2841_v42 }
  0x8e   :  { %996 = vmatpush1.msra.mxu1 %v3554_v50  ;;  %927 = vmatprep.subr.mxu0 %v3555_v47  ;;  %v3390_v50 = vand.u32 4294901760, %v2767_v53  ;;  %v2791_v47 = vsub.f32 %v1058_v58, %v2770_v61 }
  0x8f   :  { %998 = vmatprep.subr.mxu1 %v3556_v28  ;;  %931 = vmatpush2.msra.mxu0 %v3557_v39  ;;  %v1056_v28 = vld [vmem:[%s3282_s3 + $0x10] sm:$0xff]  ;;  %v1230_v39 = vand.u32 4294901760, %v1229_v1 }
  0x90   :  { %933 = vmatprep.mubr.f32.mxu0 %v3558_v52  ;;  %1000 = vmatpush1.msra.mxu1 %v3559_v34  ;;  %v3388_v34 = vand.u32 4294901760, %v2778_v27  ;;  %v3385_v4 = vand.u32 4294901760, %v2791_v47 }
  0x91   :  { %935 = vmatmul.mubr.f32.vlgmr.msra.gmra.mxu0 %v3560_v36  ;;  %1002 = vmatprep.subr.mxu1 %v3561_v37  ;;  %v1250_v37 = vsub.f32 %v2767_v53, %v3390_v50 }
  0x92   :  { %1044 = vmatprep.mubr.f32.mxu1 %v3558_v52  ;;  %1004 = vmatpush1.msra.mxu1 %v2254_v30  ;;  %v1068_v30 = vld [vmem:[%s3282_s3 + $0x70] sm:$0xff]  ;;  %v1236_v52 = vsub.f32 %v2754_v33, %v3392_v13  ;;  %v1271_v58 = vsub.f32 %v2791_v47, %v3385_v4 }
  0x93   :  { %1032 = vmatprep.subr.mxu1 %v2273_v38  ;;  %v2660_v38 = vand.u32 4294901760, %v1068_v30  ;;  %v1072_v4 = vld [vmem:[%s3282_s3 + $0x90] sm:$0xff] }
  0x94   :  { %1034 = vmatpush2.msra.mxu1 %v2303_v29  ;;  %v1237_v23 = vand.u32 4294901760, %v1236_v52  ;;  %v3379_v52 = vand.u32 4294901760, %v2854_v51 }
  0x95   :  { %1036 = vmatprep.subr.mxu1 %v3505_v41  ;;  %v2658_v41 = vsub.f32 %v1069_v20, %v2652_v56  ;;  %v3387_v20 = vand.u32 4294901760, %v2781_v32 }
  0x96   :  { %1038 = vmatpush2.msra.mxu1 %v3507_v49  ;;  %v3410_v49 = vmov 0.0  }
  0x97   :  { %1040 = vmatprep.subr.mxu1 %v2328_v43  ;;  %v3403_v29 = vand.u32 4294901760, %v2658_v41  ;;  %v2667_v43 = vsub.f32 %v1068_v30, %v2660_v38  ;;  %1085 = vmatprep.subr.mxu0 %v3410_v49  ;;  %v2809_v30 = vand.u32 4294901760, %v1057_v2  ;;  %v1264_v22 = vsub.f32 %v2781_v32, %v3387_v20 }
  0x98   :  { %1042 = vmatpush2.msra.mxu1 %v2340_v46  ;;  %v1067_v46 = vld [vmem:[%s3282_s3 + $0x68] sm:$0xff]  ;;  %1087 = vmatpush1.msra.mxu0 %v2652_v56 }
  0x99   :  { %1046 = vmatmul.mubr.f32.vlgmr.msra.gmra.mxu1 %v3560_v36  ;;  %v2669_v14 = vand.u32 4294901760, %v1067_v46  ;;  %1190 = vmatprep.subr.mxu1 %v3410_v49  ;;  %v1194_v25 = vsub.f32 %v2658_v41, %v3403_v29  ;;  %v3402_v31 = vand.u32 4294901760, %v2667_v43  ;;  %v1243_v36 = vsub.f32 %v2764_v44, %v3391_v62  ;;  %v1070_v62 = vld [vmem:[%s3282_s3 + $0x80] sm:$0xff] }
  0x9a   :  { %1088 = vmatprep.subr.mxu0 %v3410_v49  ;;  %v1265_v1 = vand.u32 4294901760, %v1264_v22  ;;  %v2996_v13 = vand.u32 4294901760, %v1070_v62 }
  0x9b   :  { %v2681_v7 = vsub.f32 %v1067_v46, %v2669_v14  ;;  %v1195_v40 = vand.u32 4294901760, %v1194_v25  ;;  %v1201_v45 = vsub.f32 %v2667_v43, %v3402_v31  ;;  %1090 = vmatpush1.msra.mxu0 %v2660_v38  ;;  %v1055_v46 = vld [vmem:[%s3282_s3 + $0x8] sm:$0xff]  ;;  %v2816_v25 = vand.u32 4294901760, %v1056_v28 }
  0x9c   :  { %1091 = vmatprep.subr.mxu0 %v3410_v49  ;;  %v2834_v16 = vand.u32 4294901760, %v1055_v46  ;;  %3572 = vst [vmem:[#allocation20_spill] sm:$0xff] %v2996_v13 }
  0x9d   :  { %v3401_v59 = vand.u32 4294901760, %v2681_v7  ;;  %1196 = vmatpush1.msra.mxu1 %v1195_v40  ;;  %v1202_v5 = vand.u32 4294901760, %v1201_v45  ;;  %1093 = vmatpush1.msra.mxu0 %v2669_v14  ;;  %v1244_v40 = vand.u32 4294901760, %v1243_v36  ;;  %v1257_v45 = vsub.f32 %v2778_v27, %v3388_v34  ;;  %v1071_v34 = vld [vmem:[%s3282_s3 + $0x88] sm:$0xff] }
  0x9e   :  { %1197 = vmatprep.subr.mxu1 %v3410_v49  ;;  %1094 = vmatprep.subr.mxu0 %v3410_v49  ;;  %v2846_v48 = vsub.f32 %v1055_v46, %v2834_v16  ;;  %v1078_v46 = vld [vmem:[%s3282_s3 + $0xc0] sm:$0xff]  ;;  %v2978_v50 = vand.u32 4294901760, %v1071_v34 }
  0x9f   :  { %v1208_v9 = vsub.f32 %v2681_v7, %v3401_v59  ;;  %1203 = vmatpush1.msra.mxu1 %v1202_v5  ;;  %1096 = vmatpush1.msra.mxu0 %v2683_v35  ;;  %v2827_v5 = vsub.f32 %v1057_v2, %v2809_v30  ;;  %v1258_v55 = vand.u32 4294901760, %v1257_v45  ;;  %v1077_v45 = vld [vmem:[%s3282_s3 + $0xb8] sm:$0xff] }
  0xa0   :  { %1204 = vmatprep.subr.mxu1 %v3410_v49  ;;  %1097 = vmatprep.subr.mxu0 %v3410_v49  ;;  %v2894_v22 = vand.u32 4294901760, %v1077_v45  ;;  %3570 = vst [vmem:[#allocation34_spill] sm:$0xff] %v2978_v50 }
  0xa1   :  { %v1209_v17 = vand.u32 4294901760, %v1208_v9  ;;  %1099 = vmatpush1.msra.mxu0 %v2698_v3  ;;  %v2832_v9 = vsub.f32 %v1056_v28, %v2816_v25  ;;  %v3384_v24 = vand.u32 4294901760, %v2827_v5  ;;  %v1272_v28 = vand.u32 4294901760, %v1271_v58  ;;  %v1076_v58 = vld [vmem:[%s3282_s3 + $0xb0] sm:$0xff] }
  0xa2   :  { %1100 = vmatprep.subr.mxu0 %v3410_v49 }
  0xa3   :  { %1210 = vmatpush1.msra.mxu1 %v1209_v17  ;;  %1102 = vmatpush1.msra.mxu0 %v2708_v11  ;;  %v1251_v17 = vand.u32 4294901760, %v1250_v37  ;;  %v1278_v2 = vsub.f32 %v2827_v5, %v3384_v24 }
  0xa4   :  { %1211 = vmatprep.subr.mxu1 %v3410_v49  ;;  %1103 = vmatprep.subr.mxu0 %v3410_v49 }
  0xa5   :  { %1217 = vmatpush1.msra.mxu1 %v1216_v26  ;;  %1105 = vmatpush1.msra.mxu0 %v2725_v8  ;;  %v3382_v26 = vand.u32 4294901760, %v2832_v9  ;;  %v1279_v36 = vand.u32 4294901760, %v1278_v2  ;;  %v2904_v2 = vsub.f32 %v1077_v45, %v2894_v22 }
  0xa6   :  { %1218 = vmatprep.subr.mxu1 %v3410_v49  ;;  %1106 = vmatprep.subr.mxu0 %v3410_v49 }
  0xa7   :  { %1224 = vmatpush1.msra.mxu1 %v1223_v18  ;;  %1108 = vmatpush1.msra.mxu0 %v2739_v57  ;;  %v3381_v18 = vand.u32 4294901760, %v2846_v48  ;;  %3562 = vst [vmem:[#allocation7_spill] sm:$0xff] %v2904_v2 }
  0xa8   :  { %1225 = vmatprep.subr.mxu1 %v3410_v49  ;;  %1109 = vmatprep.subr.mxu0 %v3410_v49 }
  0xa9   :  { %1231 = vmatpush1.msra.mxu1 %v1230_v39  ;;  %1111 = vmatpush1.msra.mxu0 %v2742_v63  ;;  %v1285_v39 = vsub.f32 %v2832_v9, %v3382_v26  ;;  %v1292_v37 = vsub.f32 %v2846_v48, %v3381_v18  ;;  %v1073_v26 = vld [vmem:[%s3282_s3 + $0x98] sm:$0xff] }
  0xaa   :  { %1232 = vmatprep.subr.mxu1 %v3410_v49  ;;  %1112 = vmatprep.subr.mxu0 %v3410_v49  ;;  %v2948_v24 = vand.u32 4294901760, %v1073_v26 }
  0xab   :  { %1238 = vmatpush1.msra.mxu1 %v1237_v23  ;;  %1114 = vmatpush1.msra.mxu0 %v2744_v6  ;;  %v2880_v23 = vand.u32 4294901760, %v1078_v46  ;;  %v1286_v21 = vand.u32 4294901760, %v1285_v39 }
  0xac   :  { %1239 = vmatprep.subr.mxu1 %v3410_v49  ;;  %1115 = vmatprep.subr.mxu0 %v3410_v49  ;;  %3565 = vst [vmem:[#allocation26_spill] sm:$0xff] %v2948_v24  ;;  %v2963_v20 = vsub.f32 %v1073_v26, %v2948_v24 }
  0xad   :  { %1245 = vmatpush1.msra.mxu1 %v1244_v40  ;;  %1117 = vmatpush1.msra.mxu0 %v2757_v19  ;;  %v1299_v40 = vsub.f32 %v2854_v51, %v3379_v52 }
  0xae   :  { %1246 = vmatprep.subr.mxu1 %v3410_v49  ;;  %1118 = vmatprep.subr.mxu0 %v3410_v49  ;;  %3567 = vst [vmem:[#allocation28_spill] sm:$0xff] %v2963_v20 }
  0xaf   :  { %1252 = vmatpush1.msra.mxu1 %v1251_v17  ;;  %1120 = vmatpush1.msra.mxu0 %v2770_v61  ;;  %v2892_v17 = vsub.f32 %v1078_v46, %v2880_v23  ;;  %v1300_v39 = vand.u32 4294901760, %v1299_v40  ;;  %v3383_v46 = vand.u32 4294901760, %v2904_v2 }
  0xb0   :  { %1253 = vmatprep.subr.mxu1 %v3410_v49  ;;  %1121 = vmatprep.subr.mxu0 %v3410_v49 }
  0xb1   :  { %1259 = vmatpush1.msra.mxu1 %v1258_v55  ;;  %1123 = vmatpush1.msra.mxu0 %v2809_v30  ;;  %v1293_v55 = vand.u32 4294901760, %v1292_v37 }
  0xb2   :  { %1260 = vmatprep.subr.mxu1 %v3410_v49  ;;  %1124 = vmatprep.subr.mxu0 %v3410_v49 }
  0xb3   :  { %1266 = vmatpush1.msra.mxu1 %v1265_v1  ;;  %1126 = vmatpush1.msra.mxu0 %v2816_v25  ;;  %v3380_v1 = vand.u32 4294901760, %v2892_v17 }
  0xb4   :  { %1267 = vmatprep.subr.mxu1 %v3410_v49  ;;  %1127 = vmatprep.subr.mxu0 %v3410_v49 }
  0xb5   :  { %1273 = vmatpush1.msra.mxu1 %v1272_v28  ;;  %1129 = vmatpush1.msra.mxu0 %v2834_v16  ;;  %v2906_v28 = vand.u32 4294901760, %v1076_v58  ;;  %v1320_v37 = vsub.f32 %v2892_v17, %v3380_v1  ;;  %v1327_v1 = vsub.f32 %v2904_v2, %v3383_v46 }
  0xb6   :  { %1274 = vmatprep.subr.mxu1 %v3410_v49  ;;  %1130 = vmatprep.subr.mxu0 %v3410_v49 }
  0xb7   :  { %1280 = vmatpush1.msra.mxu1 %v1279_v36  ;;  %1132 = vmatpush1.msra.mxu0 %v2841_v42  ;;  %v1075_v36 = vld [vmem:[%s3282_s3 + $0xa8] sm:$0xff]  ;;  %v2919_v45 = vsub.f32 %v1076_v58, %v2906_v28  ;;  %v1321_v40 = vand.u32 4294901760, %v1320_v37  ;;  %v1328_v37 = vand.u32 4294901760, %v1327_v1 }
  0xb8   :  { %1281 = vmatprep.subr.mxu1 %v3410_v49  ;;  %1147 = vmatprep.subr.mxu0 %v3410_v49  ;;  %v2921_v52 = vand.u32 4294901760, %v1075_v36 }
  0xb9   :  { %1287 = vmatpush1.msra.mxu1 %v1286_v21  ;;  %3563 = vst [vmem:[#allocation24_spill] sm:$0xff] %v2919_v45  ;;  %1149 = vmatpush2.msra.mxu0 %v2880_v23  ;;  %v1074_v21 = vld [vmem:[%s3282_s3 + $0xa0] sm:$0xff]  ;;  %v3386_v58 = vand.u32 4294901760, %v2919_v45 }
  0xba   :  { %1288 = vmatprep.subr.mxu1 %v3410_v49  ;;  %1150 = vmatprep.subr.mxu0 %v3410_v49  ;;  %v2934_v18 = vsub.f32 %v1075_v36, %v2921_v52 }
  0xbb   :  { %1294 = vmatpush1.msra.mxu1 %v1293_v55  ;;  %1152 = vmatpush2.msra.mxu0 %v2894_v22  ;;  %v2937_v55 = vand.u32 4294901760, %v1074_v21  ;;  %v1334_v46 = vsub.f32 %v2919_v45, %v3386_v58 }
  0xbc   :  { %1295 = vmatprep.subr.mxu1 %v3410_v49  ;;  %3564 = vst [vmem:[#allocation8_spill] sm:$0xff] %v2934_v18  ;;  %1153 = vmatprep.subr.mxu0 %v3410_v49  ;;  %v3389_v36 = vand.u32 4294901760, %v2934_v18 }
  0xbd   :  { %1301 = vmatpush1.msra.mxu1 %v1300_v39  ;;  %1155 = vmatpush2.msra.mxu0 %v2906_v28  ;;  %v2952_v39 = vsub.f32 %v1074_v21, %v2937_v55  ;;  %v1335_v1 = vand.u32 4294901760, %v1334_v46 }
  0xbe   :  { %1316 = vmatprep.subr.mxu1 %v3410_v49  ;;  %1156 = vmatprep.subr.mxu0 %v3410_v49  ;;  %v1341_v58 = vsub.f32 %v2934_v18, %v3389_v36  ;;  %v3395_v36 = vand.u32 4294901760, %v2963_v20 }
  0xbf   :  { %1322 = vmatpush2.msra.mxu1 %v1321_v40  ;;  %3566 = vst [vmem:[#allocation9_spill] sm:$0xff] %v2952_v39  ;;  %v2965_v40 = vand.u32 4294901760, %v1072_v4  ;;  %1158 = vmatpush2.msra.mxu0 %v2921_v52  ;;  %v3393_v21 = vand.u32 4294901760, %v2952_v39 }
  0xc0   :  { %1323 = vmatprep.subr.mxu1 %v3410_v49  ;;  %1159 = vmatprep.subr.mxu0 %v3410_v49  ;;  %v1342_v46 = vand.u32 4294901760, %v1341_v58 }
  0xc1   :  { %3568 = vst [vmem:[#allocation31_spill] sm:$0xff] %v2965_v40  ;;  %1329 = vmatpush2.msra.mxu1 %v1328_v37  ;;  %v2976_v26 = vsub.f32 %v1072_v4, %v2965_v40  ;;  %1161 = vmatpush2.msra.mxu0 %v2937_v55  ;;  %v1348_v37 = vsub.f32 %v2952_v39, %v3393_v21 }
  0xc2   :  { %1330 = vmatprep.subr.mxu1 %v3410_v49  ;;  %1162 = vmatprep.subr.mxu0 %v3410_v49  ;;  %v1355_v4 = vsub.f32 %v2963_v20, %v3395_v36 }
  0xc3   :  { %3569 = vst [vmem:[#allocation32_spill] sm:$0xff] %v2976_v26  ;;  %1336 = vmatpush2.msra.mxu1 %v1335_v1  ;;  %v3399_v58 = vand.u32 4294901760, %v2976_v26  ;;  %v2994_v1 = vsub.f32 %v1071_v34, %v2978_v50  ;;  %1164 = vmatpush2.msra.mxu0 %v2948_v24  ;;  %v1349_v21 = vand.u32 4294901760, %v1348_v37  ;;  %v3006_v34 = vsub.f32 %v1070_v62, %v2996_v13 }
  0xc4   :  { %1337 = vmatprep.subr.mxu1 %v3410_v49  ;;  %1165 = vmatprep.subr.mxu0 %v3410_v49  ;;  %v1356_v12 = vand.u32 4294901760, %v1355_v4 }
  0xc5   :  { %3571 = vst [vmem:[#allocation36_spill] sm:$0xff] %v2994_v1  ;;  %1343 = vmatpush2.msra.mxu1 %v1342_v46  ;;  %v1362_v36 = vsub.f32 %v2976_v26, %v3399_v58  ;;  %v3397_v54 = vand.u32 4294901760, %v2994_v1  ;;  %3573 = vst [vmem:[#allocation6_spill] sm:$0xff] %v3006_v34  ;;  %1167 = vmatpush2.msra.mxu0 %v2965_v40  ;;  %v3398_v4 = vand.u32 4294901760, %v3006_v34 }
  0xc6   :  { %1344 = vmatprep.subr.mxu1 %v3410_v49  ;;  %1168 = vmatprep.subr.mxu0 %v3410_v49 }
  0xc7   :  { %1350 = vmatpush2.msra.mxu1 %v1349_v21  ;;  %v1363_v46 = vand.u32 4294901760, %v1362_v36  ;;  %v1369_v37 = vsub.f32 %v2994_v1, %v3397_v54  ;;  %1170 = vmatpush2.msra.mxu0 %v2978_v50  ;;  %v1376_v21 = vsub.f32 %v3006_v34, %v3398_v4  ;;  %v74_v4 = vld [vmem:[%s3281_s2] sm:$0x3] }
  0xc8   :  { %1351 = vmatprep.subr.mxu1 %v3410_v49  ;;  %1171 = vmatprep.subr.mxu0 %v3410_v49 }
  0xc9   :  { %1357 = vmatpush2.msra.mxu1 %v1356_v12  ;;  %v1370_v62 = vand.u32 4294901760, %v1369_v37  ;;  %1173 = vmatpush2.msra.mxu0 %v2996_v13  ;;  %v1377_v36 = vand.u32 4294901760, %v1376_v21  ;;  %v76_v12 = vlaneseq }
  0xca   :  { %1358 = vmatprep.subr.mxu1 %v3410_v49  ;;  %1387 = vmatprep.subr.mxu0 %v3410_v49 }
  0xcb   :  { %1364 = vmatpush2.msra.mxu1 %v1363_v46  ;;  %v77_v37 = vshrl.u32 %v76_v12, 7 }
  0xcc   :  { %1365 = vmatprep.subr.mxu1 %v3410_v49 }
  0xcd   :  { %1371 = vmatpush2.msra.mxu1 %v1370_v62  ;;  %v78_v54 = vsub.s32 0, %v77_v37  ;;  %v82_v46 = vsub.s32 1, %v77_v37 }
  0xce   :  { %1372 = vmatprep.subr.mxu1 %v3410_v49 }
  0xcf   :  { %1378 = vmatpush2.msra.mxu1 %v1377_v36  ;;  %v79_v10 = vrot.slane %v74_v4, %v78_v54  ;;  %v83_v29 = vrot.slane %v74_v4, %v82_v46 }
  0xd0   :  { %1511 = vmatprep.subr.mxu1 %v3410_v49 }
 0x103   :  { %v220_v58 = vpop.f32.mrf.mxu0 }
 0x104   :  { %v221_v62 = vadd.f32 %v220_v58, %v79_v10 }
 0x105   :  { %v222_v59 = vpop.f32.mrf.mxu0 }
 0x106   :  { %v223_v1 = vadd.f32 %v222_v59, %v83_v29 }
 0x10a   :  { %v483_v31 = vpop.f32.mrf.mxu1 }
 0x10b   :  { %v484_v49 = vadd.f32 %v483_v31, %v221_v62  ;;  %v3580_v62 = vld [vmem:[#allocation34_spill] sm:$0xff] }
 0x10c   :  { %v485_v34 = vpop.f32.mrf.mxu1 }
 0x10d   :  { %v486_v12 = vadd.f32 %v485_v34, %v223_v1  ;;  %v3577_v1 = vld [vmem:[#allocation24_spill] sm:$0xff]  ;;  %v3578_v34 = vld [vmem:[#allocation31_spill] sm:$0xff] }
 0x129   :  { %v634_v21 = vpop.f32.mrf.mxu0 }
 0x12a   :  { %v635_v13 = vadd.f32 %v634_v21, %v484_v49  ;;  %v3579_v21 = vld [vmem:[#allocation8_spill] sm:$0xff] }
 0x12b   :  { %v636_v36 = vpop.f32.mrf.mxu0 }
 0x12c   :  { %v637_v50 = vadd.f32 %v636_v36, %v486_v12  ;;  %v3581_v36 = vld [vmem:[#allocation9_spill] sm:$0xff]  ;;  %v3582_v12 = vld [vmem:[#allocation20_spill] sm:$0xff] }
 0x132   :  { %v749_v26 = vpop.f32.mrf.mxu1 }
 0x133   :  { %v750_v18 = vadd.f32 %v749_v26, %v635_v13  ;;  %v3576_v26 = vld [vmem:[#allocation26_spill] sm:$0xff] }
 0x134   :  { %v751_v39 = vpop.f32.mrf.mxu1 }
 0x135   :  { %v752_v45 = vadd.f32 %v751_v39, %v637_v50 }
 0x151   :  { %v936_v20 = vpop.f32.mrf.mxu0 }
 0x152   :  { %v937_v37 = vadd.f32 %v936_v20, %v750_v18  ;;  %v3574_v18 = vmov 0.0  }
 0x153   :  { %v938_v40 = vpop.f32.mrf.mxu0 }
 0x154   :  { %v939_v24 = vadd.f32 %v938_v40, %v752_v45  ;;  %v3575_v40 = vld [vmem:[#allocation7_spill] sm:$0xff] }
 0x159   :  { %v1047_v54 = vpop.f32.mrf.mxu1 }
 0x15a   :  { %v1048_v2 = vadd.f32 %v1047_v54, %v937_v37  ;;  %v3583_v37 = vld [vmem:[#allocation28_spill] sm:$0xff] }
 0x15b   :  { %v1049_v4 = vpop.f32.mrf.mxu1  ;;  %v3584_v54 = vld [vmem:[#allocation32_spill] sm:$0xff] }
 0x15c   :  { %v1052_v46 = vmax.f32 %v1048_v2, 0.0  ;;  %v1050_v10 = vadd.f32 %v1049_v4, %v939_v24  ;;  %v3585_v4 = vld [vmem:[#allocation36_spill] sm:$0xff] }
 0x15e   :  { %v3029_v29 = vand.u32 4294901760, %v1052_v46  ;;  %v1053_v59 = vmax.f32 %v1050_v10, 0.0 }
 0x160   :  { %v3032_v31 = vsub.f32 %v1052_v46, %v3029_v29  ;;  %v1083_v49 = vsel %vm1081_vm2, %v1053_v59, 0 }
 0x161   :  { %v3034_v58 = vand.u32 4294901760, %v1083_v49 }
 0x162   :  { %v1182_v13 = vand.u32 4294901760, %v3032_v31 }
 0x163   :  { %v1175_v50 = vsub.f32 %v1083_v49, %v3034_v58  ;;  %1380 = vmatprep.mubr.f32.mxu1 %v3034_v58 }
 0x164   :  { %1382 = vmatmul.mubr.f32.vlgmr.msra.gmra.mxu1 %v3029_v29  ;;  %v1183_v24 = vsub.f32 %v3032_v31, %v1182_v13 }
 0x165   :  { %1513 = vmatpush1.msra.mxu1 %v2652_v56  ;;  %v1176_v20 = vand.u32 4294901760, %v1175_v50 }
 0x166   :  { %1514 = vmatprep.subr.mxu1 %v3574_v18  ;;  %v1184_v39 = vand.u32 4294901760, %v1183_v24 }
 0x167   :  { %1516 = vmatpush1.msra.mxu1 %v2660_v38  ;;  %1603 = vmatprep.mubr.f32.mxu1 %v1176_v20  ;;  %v1177_v2 = vsub.f32 %v1175_v50, %v1176_v20 }
 0x168   :  { %1517 = vmatprep.subr.mxu1 %v3574_v18 }
 0x169   :  { %1519 = vmatpush1.msra.mxu1 %v2669_v14  ;;  %v1178_v45 = vand.u32 4294901760, %v1177_v2 }
 0x16a   :  { %1520 = vmatprep.subr.mxu1 %v3574_v18 }
 0x16b   :  { %1522 = vmatpush1.msra.mxu1 %v2683_v35  ;;  %1179 = vmatprep.mubr.f32.mxu0 %v1178_v45 }
 0x16c   :  { %1523 = vmatprep.subr.mxu1 %v3574_v18  ;;  %1185 = vmatmul.mubr.f32.vlgmr.msra.gmra.mxu0 %v1184_v39 }
 0x16d   :  { %1390 = vmatpush1.msra.mxu0 %v2658_v41  ;;  %1525 = vmatpush1.msra.mxu1 %v2698_v3 }
 0x16e   :  { %1391 = vmatprep.subr.mxu0 %v3574_v18  ;;  %1503 = vmatprep.mubr.f32.mxu0 %v1175_v50 }
 0x16f   :  { %1526 = vmatprep.subr.mxu1 %v3574_v18  ;;  %1394 = vmatpush1.msra.mxu0 %v2667_v43 }
 0x170   :  { %1528 = vmatpush1.msra.mxu1 %v2708_v11  ;;  %1395 = vmatprep.subr.mxu0 %v3574_v18 }
 0x171   :  { %1529 = vmatprep.subr.mxu1 %v3574_v18  ;;  %1398 = vmatpush1.msra.mxu0 %v2681_v7 }
 0x172   :  { %1531 = vmatpush1.msra.mxu1 %v2725_v8  ;;  %1399 = vmatprep.subr.mxu0 %v3574_v18 }
 0x173   :  { %1532 = vmatprep.subr.mxu1 %v3574_v18  ;;  %1402 = vmatpush1.msra.mxu0 %v2695_v0 }
 0x174   :  { %1534 = vmatpush1.msra.mxu1 %v2739_v57  ;;  %1403 = vmatprep.subr.mxu0 %v3574_v18 }
 0x175   :  { %1535 = vmatprep.subr.mxu1 %v3574_v18  ;;  %1406 = vmatpush1.msra.mxu0 %v2713_v15 }
 0x176   :  { %1537 = vmatpush1.msra.mxu1 %v2742_v63  ;;  %1407 = vmatprep.subr.mxu0 %v3574_v18 }
 0x177   :  { %1538 = vmatprep.subr.mxu1 %v3574_v18  ;;  %1410 = vmatpush1.msra.mxu0 %v2723_v60 }
 0x178   :  { %1540 = vmatpush1.msra.mxu1 %v2744_v6  ;;  %1411 = vmatprep.subr.mxu0 %v3574_v18 }
 0x179   :  { %1541 = vmatprep.subr.mxu1 %v3574_v18  ;;  %1414 = vmatpush1.msra.mxu0 %v2754_v33 }
 0x17a   :  { %1543 = vmatpush1.msra.mxu1 %v2757_v19  ;;  %1415 = vmatprep.subr.mxu0 %v3574_v18 }
 0x17b   :  { %1544 = vmatprep.subr.mxu1 %v3574_v18  ;;  %1418 = vmatpush1.msra.mxu0 %v2764_v44 }
 0x17c   :  { %1546 = vmatpush1.msra.mxu1 %v2770_v61  ;;  %1419 = vmatprep.subr.mxu0 %v3574_v18 }
 0x17d   :  { %1547 = vmatprep.subr.mxu1 %v3574_v18  ;;  %1422 = vmatpush1.msra.mxu0 %v2767_v53 }
 0x17e   :  { %1549 = vmatpush1.msra.mxu1 %v2809_v30  ;;  %1423 = vmatprep.subr.mxu0 %v3574_v18 }
 0x17f   :  { %1550 = vmatprep.subr.mxu1 %v3574_v18  ;;  %1426 = vmatpush1.msra.mxu0 %v2778_v27 }
 0x180   :  { %1552 = vmatpush1.msra.mxu1 %v2816_v25  ;;  %1427 = vmatprep.subr.mxu0 %v3574_v18 }
 0x181   :  { %1553 = vmatprep.subr.mxu1 %v3574_v18  ;;  %1430 = vmatpush1.msra.mxu0 %v2781_v32 }
 0x182   :  { %1555 = vmatpush1.msra.mxu1 %v2834_v16  ;;  %1431 = vmatprep.subr.mxu0 %v3574_v18 }
 0x183   :  { %1556 = vmatprep.subr.mxu1 %v3574_v18  ;;  %1434 = vmatpush1.msra.mxu0 %v2791_v47 }
 0x184   :  { %1558 = vmatpush1.msra.mxu1 %v2841_v42  ;;  %1435 = vmatprep.subr.mxu0 %v3574_v18 }
 0x185   :  { %1573 = vmatprep.subr.mxu1 %v3574_v18  ;;  %1438 = vmatpush1.msra.mxu0 %v2827_v5 }
 0x186   :  { %1575 = vmatpush2.msra.mxu1 %v2880_v23  ;;  %1439 = vmatprep.subr.mxu0 %v3574_v18 }
 0x187   :  { %1576 = vmatprep.subr.mxu1 %v3574_v18  ;;  %1442 = vmatpush1.msra.mxu0 %v2832_v9 }
 0x188   :  { %1578 = vmatpush2.msra.mxu1 %v2894_v22  ;;  %1443 = vmatprep.subr.mxu0 %v3574_v18 }
 0x189   :  { %1579 = vmatprep.subr.mxu1 %v3574_v18  ;;  %1446 = vmatpush1.msra.mxu0 %v2846_v48 }
 0x18a   :  { %1581 = vmatpush2.msra.mxu1 %v2906_v28  ;;  %1447 = vmatprep.subr.mxu0 %v3574_v18 }
 0x18b   :  { %1582 = vmatprep.subr.mxu1 %v3574_v18  ;;  %1450 = vmatpush1.msra.mxu0 %v2854_v51 }
 0x18c   :  { %1584 = vmatpush2.msra.mxu1 %v2921_v52  ;;  %1465 = vmatprep.subr.mxu0 %v3574_v18 }
 0x18d   :  { %1585 = vmatprep.subr.mxu1 %v3574_v18  ;;  %1468 = vmatpush2.msra.mxu0 %v2892_v17 }
 0x18e   :  { %1587 = vmatpush2.msra.mxu1 %v2937_v55  ;;  %1469 = vmatprep.subr.mxu0 %v3574_v18 }
 0x18f   :  { %1588 = vmatprep.subr.mxu1 %v3574_v18  ;;  %1472 = vmatpush2.msra.mxu0 %v3575_v40 }
 0x190   :  { %1590 = vmatpush2.msra.mxu1 %v3576_v26  ;;  %1473 = vmatprep.subr.mxu0 %v3574_v18 }
 0x191   :  { %1591 = vmatprep.subr.mxu1 %v3574_v18  ;;  %1476 = vmatpush2.msra.mxu0 %v3577_v1 }
 0x192   :  { %1593 = vmatpush2.msra.mxu1 %v3578_v34  ;;  %1477 = vmatprep.subr.mxu0 %v3574_v18 }
 0x193   :  { %1594 = vmatprep.subr.mxu1 %v3574_v18  ;;  %1480 = vmatpush2.msra.mxu0 %v3579_v21 }
 0x194   :  { %1596 = vmatpush2.msra.mxu1 %v3580_v62  ;;  %1481 = vmatprep.subr.mxu0 %v3574_v18 }
 0x195   :  { %1597 = vmatprep.subr.mxu1 %v3574_v18  ;;  %1484 = vmatpush2.msra.mxu0 %v3581_v36 }
 0x196   :  { %1599 = vmatpush2.msra.mxu1 %v3582_v12  ;;  %1485 = vmatprep.subr.mxu0 %v3574_v18 }
 0x197   :  { %1607 = vmatmul.mubr.f32.vlgmr.msra.gmra.mxu1 %v1182_v13  ;;  %1759 = vmatprep.subr.mxu1 %v3574_v18 }
 0x198   :  { %1488 = vmatpush2.msra.mxu0 %v3583_v37  ;;  %1761 = vmatpush1.msra.mxu1 %v2652_v56  ;;  %v3586_v56 = vld [vmem:[#allocation6_spill] sm:$0xff] }
 0x199   :  { %1849 = vmatprep.mubr.f32.mxu1 %v3034_v58  ;;  %1489 = vmatprep.subr.mxu0 %v3574_v18 }
 0x19a   :  { %1762 = vmatprep.subr.mxu1 %v3574_v18  ;;  %1492 = vmatpush2.msra.mxu0 %v3584_v54 }
 0x19b   :  { %1764 = vmatpush1.msra.mxu1 %v2660_v38  ;;  %1493 = vmatprep.subr.mxu0 %v3574_v18  ;;  %v3587_v38 = vand.u32 4294901760, %v2658_v41  ;;  %v3589_v41 = vand.u32 4294901760, %v2681_v7  ;;  %v3592_v7 = vand.u32 4294901760, %v2723_v60  ;;  %v3597_v60 = vand.u32 4294901760, %v2781_v32 }
 0x19c   :  { %1765 = vmatprep.subr.mxu1 %v3574_v18  ;;  %1496 = vmatpush2.msra.mxu0 %v3585_v4  ;;  %v3608_v32 = vand.u32 4294901760, %v3583_v37 }
 0x19d   :  { %1767 = vmatpush1.msra.mxu1 %v2669_v14  ;;  %1497 = vmatprep.subr.mxu0 %v3574_v18  ;;  %v3588_v14 = vand.u32 4294901760, %v2667_v43  ;;  %v3591_v43 = vand.u32 4294901760, %v2713_v15  ;;  %v3596_v15 = vand.u32 4294901760, %v2778_v27  ;;  %v3607_v27 = vand.u32 4294901760, %v3581_v36 }
 0x19e   :  { %1768 = vmatprep.subr.mxu1 %v3574_v18  ;;  %1500 = vmatpush2.msra.mxu0 %v3586_v56 }
 0x19f   :  { %1770 = vmatpush1.msra.mxu1 %v2683_v35  ;;  %1506 = vmatmul.mubr.f32.vlgmr.msra.gmra.mxu0 %v3032_v31  ;;  %v3590_v35 = vand.u32 4294901760, %v2695_v0  ;;  %v3593_v0 = vand.u32 4294901760, %v2754_v33  ;;  %v3602_v33 = vand.u32 4294901760, %v2854_v51 }
 0x1a0   :  { %1612 = vmatprep.subr.mxu0 %v3574_v18  ;;  %1771 = vmatprep.subr.mxu1 %v3574_v18 }
 0x1a1   :  { %1616 = vmatpush1.msra.mxu0 %v3587_v38  ;;  %1752 = vmatprep.mubr.f32.mxu0 %v3034_v58 }
 0x1a2   :  { %1773 = vmatpush1.msra.mxu1 %v2698_v3  ;;  %1617 = vmatprep.subr.mxu0 %v3574_v18  ;;  %v3594_v3 = vand.u32 4294901760, %v2764_v44  ;;  %v3604_v44 = vand.u32 4294901760, %v3575_v40 }
 0x1a3   :  { %1774 = vmatprep.subr.mxu1 %v3574_v18  ;;  %1621 = vmatpush1.msra.mxu0 %v3588_v14 }
 0x1a4   :  { %1776 = vmatpush1.msra.mxu1 %v2708_v11  ;;  %1622 = vmatprep.subr.mxu0 %v3574_v18  ;;  %v3595_v11 = vand.u32 4294901760, %v2767_v53  ;;  %v3605_v53 = vand.u32 4294901760, %v3577_v1 }
 0x1a5   :  { %1777 = vmatprep.subr.mxu1 %v3574_v18  ;;  %1626 = vmatpush1.msra.mxu0 %v3589_v41 }
 0x1a6   :  { %1779 = vmatpush1.msra.mxu1 %v2725_v8  ;;  %1627 = vmatprep.subr.mxu0 %v3574_v18  ;;  %v3598_v8 = vand.u32 4294901760, %v2791_v47  ;;  %v3609_v47 = vand.u32 4294901760, %v3584_v54 }
 0x1a7   :  { %1780 = vmatprep.subr.mxu1 %v3574_v18  ;;  %1631 = vmatpush1.msra.mxu0 %v3590_v35 }
 0x1a8   :  { %1782 = vmatpush1.msra.mxu1 %v2739_v57  ;;  %1632 = vmatprep.subr.mxu0 %v3574_v18  ;;  %v3599_v57 = vand.u32 4294901760, %v2827_v5 }
 0x1a9   :  { %1783 = vmatprep.subr.mxu1 %v3574_v18  ;;  %1636 = vmatpush1.msra.mxu0 %v3591_v43 }
 0x1aa   :  { %1785 = vmatpush1.msra.mxu1 %v2742_v63  ;;  %1637 = vmatprep.subr.mxu0 %v3574_v18  ;;  %v3600_v63 = vand.u32 4294901760, %v2832_v9 }
 0x1ab   :  { %1786 = vmatprep.subr.mxu1 %v3574_v18  ;;  %1641 = vmatpush1.msra.mxu0 %v3592_v7 }
 0x1ac   :  { %1788 = vmatpush1.msra.mxu1 %v2744_v6  ;;  %1642 = vmatprep.subr.mxu0 %v3574_v18  ;;  %v3601_v6 = vand.u32 4294901760, %v2846_v48 }
 0x1ad   :  { %1789 = vmatprep.subr.mxu1 %v3574_v18  ;;  %1646 = vmatpush1.msra.mxu0 %v3593_v0 }
 0x1ae   :  { %1791 = vmatpush1.msra.mxu1 %v2757_v19  ;;  %1647 = vmatprep.subr.mxu0 %v3574_v18  ;;  %v3603_v19 = vand.u32 4294901760, %v2892_v17 }
 0x1af   :  { %1792 = vmatprep.subr.mxu1 %v3574_v18  ;;  %1651 = vmatpush1.msra.mxu0 %v3594_v3 }
 0x1b0   :  { %1794 = vmatpush1.msra.mxu1 %v2770_v61  ;;  %1652 = vmatprep.subr.mxu0 %v3574_v18  ;;  %v3606_v61 = vand.u32 4294901760, %v3579_v21 }
 0x1b1   :  { %1795 = vmatprep.subr.mxu1 %v3574_v18  ;;  %1656 = vmatpush1.msra.mxu0 %v3595_v11 }
 0x1b2   :  { %1797 = vmatpush1.msra.mxu1 %v2809_v30  ;;  %1657 = vmatprep.subr.mxu0 %v3574_v18  ;;  %v3610_v30 = vand.u32 4294901760, %v3585_v4 }
 0x1b3   :  { %1798 = vmatprep.subr.mxu1 %v3574_v18  ;;  %1661 = vmatpush1.msra.mxu0 %v3596_v15 }
 0x1b4   :  { %1800 = vmatpush1.msra.mxu1 %v2816_v25  ;;  %1662 = vmatprep.subr.mxu0 %v3574_v18  ;;  %v3611_v25 = vand.u32 4294901760, %v3586_v56 }
 0x1b5   :  { %1801 = vmatprep.subr.mxu1 %v3574_v18  ;;  %1666 = vmatpush1.msra.mxu0 %v3597_v60 }
 0x1b6   :  { %1803 = vmatpush1.msra.mxu1 %v2834_v16  ;;  %1667 = vmatprep.subr.mxu0 %v3574_v18  ;;  %v1080_v16 = vstv %s3283_s4 }
 0x1b7   :  { %1804 = vmatprep.subr.mxu1 %v3574_v18  ;;  %1671 = vmatpush1.msra.mxu0 %v3598_v8 }
 0x1b8   :  { %1806 = vmatpush1.msra.mxu1 %v2841_v42  ;;  %1672 = vmatprep.subr.mxu0 %v3574_v18 }
 0x1b9   :  { %1821 = vmatprep.subr.mxu1 %v3574_v18  ;;  %1676 = vmatpush1.msra.mxu0 %v3599_v57 }
 0x1ba   :  { %1823 = vmatpush2.msra.mxu1 %v2880_v23  ;;  %1677 = vmatprep.subr.mxu0 %v3574_v18 }
 0x1bb   :  { %1824 = vmatprep.subr.mxu1 %v3574_v18  ;;  %1681 = vmatpush1.msra.mxu0 %v3600_v63 }
 0x1bc   :  { %1826 = vmatpush2.msra.mxu1 %v2894_v22  ;;  %1682 = vmatprep.subr.mxu0 %v3574_v18 }
 0x1bd   :  { %1827 = vmatprep.subr.mxu1 %v3574_v18  ;;  %1686 = vmatpush1.msra.mxu0 %v3601_v6 }
 0x1be   :  { %1829 = vmatpush2.msra.mxu1 %v2906_v28  ;;  %1687 = vmatprep.subr.mxu0 %v3574_v18 }
 0x1bf   :  { %1830 = vmatprep.subr.mxu1 %v3574_v18  ;;  %1691 = vmatpush1.msra.mxu0 %v3602_v33 }
 0x1c0   :  { %1832 = vmatpush2.msra.mxu1 %v2921_v52  ;;  %1706 = vmatprep.subr.mxu0 %v3574_v18 }
 0x1c1   :  { %1833 = vmatprep.subr.mxu1 %v3574_v18  ;;  %1710 = vmatpush2.msra.mxu0 %v3603_v19 }
 0x1c2   :  { %1835 = vmatpush2.msra.mxu1 %v2937_v55  ;;  %1711 = vmatprep.subr.mxu0 %v3574_v18 }
 0x1c3   :  { %1836 = vmatprep.subr.mxu1 %v3574_v18  ;;  %1715 = vmatpush2.msra.mxu0 %v3604_v44 }
 0x1c4   :  { %1838 = vmatpush2.msra.mxu1 %v3576_v26  ;;  %1716 = vmatprep.subr.mxu0 %v3574_v18 }
 0x1c5   :  { %1839 = vmatprep.subr.mxu1 %v3574_v18  ;;  %1720 = vmatpush2.msra.mxu0 %v3605_v53 }
 0x1c6   :  { %1841 = vmatpush2.msra.mxu1 %v3578_v34  ;;  %1721 = vmatprep.subr.mxu0 %v3574_v18 }
 0x1c7   :  { %1842 = vmatprep.subr.mxu1 %v3574_v18  ;;  %1725 = vmatpush2.msra.mxu0 %v3606_v61 }
 0x1c8   :  { %1844 = vmatpush2.msra.mxu1 %v3580_v62  ;;  %1726 = vmatprep.subr.mxu0 %v3574_v18 }
 0x1c9   :  { %1845 = vmatprep.subr.mxu1 %v3574_v18  ;;  %1730 = vmatpush2.msra.mxu0 %v3607_v27 }
 0x1ca   :  { %1847 = vmatpush2.msra.mxu1 %v3582_v12  ;;  %1731 = vmatprep.subr.mxu0 %v3574_v18 }
 0x1cb   :  { %1851 = vmatmul.mubr.f32.vlgmr.msra.gmra.mxu1 %v3029_v29  ;;  %1735 = vmatpush2.msra.mxu0 %v3608_v32 }
 0x1cc   :  { %1736 = vmatprep.subr.mxu0 %v3574_v18 }
 0x1cd   :  { %1740 = vmatpush2.msra.mxu0 %v3609_v47 }
 0x1ce   :  { %1741 = vmatprep.subr.mxu0 %v3574_v18 }
 0x1cf   :  { %1745 = vmatpush2.msra.mxu0 %v3610_v30 }
 0x1d0   :  { %1746 = vmatprep.subr.mxu0 %v3574_v18 }
 0x1d1   :  { %1750 = vmatpush2.msra.mxu0 %v3611_v25 }
 0x1d2   :  { %1754 = vmatmul.mubr.f32.vlgmr.msra.gmra.mxu0 %v3029_v29 }
 0x224   :  { %v1383_v5 = vpop.f32.mrf.mxu1 }
 0x226   :  { %v1385_v9 = vpop.f32.mrf.mxu1 }
 0x22c   :  { %v1186_v42 = vpop.f32.mrf.mxu0 }
 0x22d   :  { %v1187_v48 = vadd.f32 %v1186_v42, %v1080_v16 }
 0x22e   :  { %v1188_v51 = vpop.f32.mrf.mxu0 }
 0x22f   :  { %v1384_v52 = vadd.f32 %v1383_v5, %v1187_v48 }
 0x257   :  { %v1608_v23 = vpop.f32.mrf.mxu1 }
 0x259   :  { %v1610_v17 = vpop.f32.mrf.mxu1 }
 0x25f   :  { %v1507_v22 = vpop.f32.mrf.mxu0 }
 0x260   :  { %v1508_v46 = vadd.f32 %v1507_v22, %v1384_v52 }
 0x261   :  { %v1509_v28 = vpop.f32.mrf.mxu0 }
 0x262   :  { %v1609_v59 = vadd.f32 %v1608_v23, %v1508_v46 }
 0x28b   :  { %v1852_v55 = vpop.f32.mrf.mxu1 }
 0x28d   :  { %v1854_v10 = vpop.f32.mrf.mxu1 }
 0x292   :  { %v1755_v31 = vpop.f32.mrf.mxu0 }
 0x293   :  { %v1756_v29 = vadd.f32 %v1755_v31, %v1609_v59 }
 0x294   :  { %v1757_v49 = vpop.f32.mrf.mxu0 }
 0x295   :  { %v1853_v58 = vadd.f32 %v1852_v55, %v1756_v29 }
 0x297   :  { %1857 = vst.msk [vmem:[%s3284_s5] sm:$0x3] %vm1856_vm3, %v1853_v58 }
 0x298   :  { %1862 = vsyncpa [#allocation4], 1 }

</bundles_post_ra>
